<compile_context>
chip_gen: v6e
topology: v6e:2x2x1
jax: 0.10.0
libtpu: 0.0.40
codegen_flags: <defaults>
</compile_context>

<pallas_src>
import math

import jax
import jax.numpy as jnp
from jax.experimental import pallas as pl
from jax.experimental.pallas import tpu as pltpu

# ----------------------------- configuration --------------------------------
B = 2           # batch
N = 8           # number of nodes (sequence length)
D = 32          # model_size
FF = 64         # ff_size
H = 4           # num_head
DK = D // H     # per-head dim (8)
LAYERS = 2      # encoder_layer
EPS = 1e-5      # BatchNorm eps

# lane-padded sizes (wrapper pads with zeros; kernel works on padded shapes)
DP = 128        # padded model_size   (lane-dense)
FP = 128        # padded ff_size      (lane-dense)
DKP = 32        # padded per-head dim (lane-aligned 32-wide q/k/v blocks)


# ------------------------------ Pallas kernel --------------------------------
def graph_encoder_kernel(h_ref,
                         wqkv_ref, wo_ref,
                         bn1_g_ref, bn1_b_ref,
                         w1_ref, fb1_ref, w2_ref, fb2_ref,
                         bn2_g_ref, bn2_b_ref,
                         h_out_ref, g_out_ref):
    """Full GraphEncoder forward (mask=None path), all layers fused.

    Shapes (padded):
      h_ref      : (B, N, DP)
      wqkv_ref   : (L, H, DP, 3*DKP)   1/sqrt(dk) folded into the Q block
      wo_ref     : (L, H, DKP, DP)
      bn*_g/b    : (L, 1, DP)
      w1/fb1     : (L, DP, FP) / (L, 1, FP)
      w2/fb2     : (L, FP, DP) / (L, 1, DP)
    """
    b_, n_, dp = h_ref.shape
    rows = b_ * n_
    h_cur = h_ref[...].reshape(rows, dp)                          # (R, DP)

    for l in range(LAYERS):                                       # static unroll (L=2)
        # ---- multi-head self-attention: heads on a leading batch axis ----
        h_b = jnp.broadcast_to(h_cur, (H, rows, dp))               # (H, R, DP), vreg copies
        qkv = jnp.einsum('hrd,hdc->hrc', h_b, wqkv_ref[l],
                         preferred_element_type=jnp.float32)       # (H, R, 3*DKP)

        # 32-lane, lane-aligned slices; leading-dim-only reshapes (no relayout)
        q = qkv[:, :, 0 * DKP:1 * DKP].reshape(H * b_, n_, DKP)    # (B*H, N, DKP)
        k = qkv[:, :, 1 * DKP:2 * DKP].reshape(H * b_, n_, DKP)
        v = qkv[:, :, 2 * DKP:3 * DKP].reshape(H * b_, n_, DKP)

        s = jnp.einsum('znk,zmk->znm', q, k,
                       preferred_element_type=jnp.float32)         # (B*H, N, N)
        s = s - jnp.max(s, axis=-1, keepdims=True)
        p = jnp.exp(s)
        # exact EUP reciprocal (slot has slack; keeps accuracy tight)
        p = p * pl.reciprocal(jnp.sum(p, axis=-1, keepdims=True), approx=False)
        ctx = jnp.einsum('znm,zmk->znk', p, v,
                         preferred_element_type=jnp.float32)       # (B*H, N, DKP)

        # per-head output projection (batched over H) + leading-axis sum
        ctx = ctx.reshape(H, rows, DKP)                            # (H, R, DKP)
        h_attn = jnp.sum(
            jnp.einsum('hrc,hcd->hrd', ctx, wo_ref[l],
                       preferred_element_type=jnp.float32),
            axis=0)                                                # (R, DP)

        # ---- residual + BatchNorm1d (stats over B*N rows, per channel) ----
        x1 = h_cur + h_attn
        mean1 = jnp.mean(x1, axis=0, keepdims=True)
        c1 = x1 - mean1                                            # shifted two-pass var
        var1 = jnp.mean(c1 * c1, axis=0, keepdims=True)
        scale1 = jax.lax.rsqrt(var1 + EPS) * bn1_g_ref[l]          # fused rsqrt*gamma
        hbn1 = c1 * scale1 + bn1_b_ref[l]                          # one mul-add

        # ---- FFN ----
        ff = jnp.maximum(
            jnp.dot(hbn1, w1_ref[l], preferred_element_type=jnp.float32) + fb1_ref[l],
            0.0)
        ff2 = jnp.dot(ff, w2_ref[l], preferred_element_type=jnp.float32) + fb2_ref[l]

        # ---- residual + BatchNorm1d, encoder-level residual folded in ----
        x2 = hbn1 + ff2
        mean2 = jnp.mean(x2, axis=0, keepdims=True)
        c2 = x2 - mean2
        var2 = jnp.mean(c2 * c2, axis=0, keepdims=True)
        scale2 = jax.lax.rsqrt(var2 + EPS) * bn2_g_ref[l]
        h_cur = h_cur + (c2 * scale2 + bn2_b_ref[l])               # h_out = h_out + h_in

    h_full = h_cur.reshape(b_, n_, dp)
    h_out_ref[...] = h_full                                        # lane-dense (DP=128) store
    g_out_ref[...] = jnp.mean(h_full, axis=1)                      # graph mean over nodes
    # TODO(synk): masked path (`h_out[mask] = 0` / attention masking) not
    # implemented — GraphMultiHeadAttention mask semantics not provided.
    # TODO(synk): BatchNorm running-mean/var (eval mode) not produced; this is
    # the training-mode forward only.


# ------------------------------ wrappers --------------------------------------
_VMEM_SPEC = pl.BlockSpec(memory_space=pltpu.MemorySpace.VMEM)


@jax.jit
def graph_encoder(h, packed):
    b_, n_, d_ = h.shape
    hp = jnp.pad(h, ((0, 0), (0, 0), (0, DP - d_)))                # lane-pad input channels
    out_shapes = (jax.ShapeDtypeStruct((b_, n_, DP), jnp.float32),
                  jax.ShapeDtypeStruct((b_, DP), jnp.float32))
    h_out_p, g_out_p = pl.pallas_call(
        graph_encoder_kernel,
        out_shape=out_shapes,
        in_specs=[_VMEM_SPEC] * (1 + len(packed)),
        out_specs=(_VMEM_SPEC, _VMEM_SPEC),
    )(hp, *packed)
    # strip channel padding outside the kernel (fused by XLA under this jit)
    return h_out_p[:, :, :d_], g_out_p[:, :d_]


def pack_params(all_params):
    """Stack per-layer params on a leading LAYERS axis, lane-pad D->DP, FF->FP,
    DK->DKP (all zero padding: weights/bias/gamma/beta, so padded channels stay 0),
    fold 1/sqrt(dk) into the Q block, and keep heads on a leading axis."""
    scale = 1.0 / math.sqrt(DK)

    def pad_heads(W, s=1.0):      # (H, D, DK) -> (H, DP, DKP)
        return jnp.pad(W * s, ((0, 0), (0, DP - D), (0, DKP - DK)))

    wqkv_l, wo_l = [], []
    g1_l, be1_l, w1_l, b1_l, w2_l, b2_l, g2_l, be2_l = ([] for _ in range(8))
    for (Wq, Wk, Wv, Wo, bn1_g, bn1_b, W1, b1, W2, b2, bn2_g, bn2_b) in all_params:
        wqkv_l.append(jnp.concatenate(
            [pad_heads(Wq, scale), pad_heads(Wk), pad_heads(Wv)], axis=-1))  # (H, DP, 3*DKP)
        wo_l.append(jnp.pad(Wo, ((0, 0), (0, DKP - DK), (0, DP - D))))       # (H, DKP, DP)
        g1_l.append(jnp.pad(bn1_g, ((0, 0), (0, DP - D))))
        be1_l.append(jnp.pad(bn1_b, ((0, 0), (0, DP - D))))
        w1_l.append(jnp.pad(W1, ((0, DP - D), (0, FP - FF))))
        b1_l.append(jnp.pad(b1, ((0, 0), (0, FP - FF))))
        w2_l.append(jnp.pad(W2, ((0, FP - FF), (0, DP - D))))
        b2_l.append(jnp.pad(b2, ((0, 0), (0, DP - D))))
        g2_l.append(jnp.pad(bn2_g, ((0, 0), (0, DP - D))))
        be2_l.append(jnp.pad(bn2_b, ((0, 0), (0, DP - D))))

    stack = lambda xs: jnp.stack(xs, axis=0)
    return (stack(wqkv_l), stack(wo_l),
            stack(g1_l), stack(be1_l),
            stack(w1_l), stack(b1_l), stack(w2_l), stack(b2_l),
            stack(g2_l), stack(be2_l))


# ------------------------------ reference (plain JAX) -------------------------
def ref_layer(h, params):
    Wq, Wk, Wv, Wo, g1, b1, W1, bb1, W2, bb2, g2, b2 = params
    q = jnp.einsum('bnd,hdk->bhnk', h, Wq)
    k = jnp.einsum('bnd,hdk->bhnk', h, Wk)
    v = jnp.einsum('bnd,hdk->bhnk', h, Wv)
    s = jnp.einsum('bhnk,bhmk->bhnm', q, k) / math.sqrt(DK)
    p = jax.nn.softmax(s, axis=-1)
    ctx = jnp.einsum('bhnm,bhmk->bhnk', p, v)
    h_attn = jnp.einsum('bhnk,hkd->bnd', ctx, Wo)

    x1 = (h + h_attn).reshape(-1, D)
    m1, v1 = x1.mean(0), x1.var(0)
    hbn1 = (x1 - m1) / jnp.sqrt(v1 + EPS) * g1[0] + b1[0]
    ff = jax.nn.relu(hbn1 @ W1 + bb1[0])
    ff2 = ff @ W2 + bb2[0]
    x2 = hbn1 + ff2
    m2, v2 = x2.mean(0), x2.var(0)
    hbn2 = (x2 - m2) / jnp.sqrt(v2 + EPS) * g2[0] + b2[0]
    return hbn2.reshape(h.shape)


def ref_encoder(h, all_params):
    h_out = h
    for params in all_params:
        h_out = h_out + ref_layer(h_out, params)
    return h_out, h_out.mean(1)


# ------------------------------ parameter init --------------------------------
def init_layer_params(key):
    ks = jax.random.split(key, 8)

    def unif(k, shape, fan_in):
        bound = 1.0 / math.sqrt(fan_in)
        return jax.random.uniform(k, shape, jnp.float32, -bound, bound)

    Wq = unif(ks[0], (H, D, DK), D)
    Wk = unif(ks[1], (H, D, DK), D)
    Wv = unif(ks[2], (H, D, DK), D)
    Wo = unif(ks[3], (H, DK, D), D)
    bn1_g = jnp.ones((1, D), jnp.float32)
    bn1_b = jnp.zeros((1, D), jnp.float32)
    W1 = unif(ks[4], (D, FF), D)
    b1 = unif(ks[5], (1, FF), D)
    W2 = unif(ks[6], (FF, D), FF)
    b2 = unif(ks[7], (1, D), FF)
    bn2_g = jnp.ones((1, D), jnp.float32)
    bn2_b = jnp.zeros((1, D), jnp.float32)
    return (Wq, Wk, Wv, Wo, bn1_g, bn1_b, W1, b1, W2, b2, bn2_g, bn2_b)


# ------------------------------ main ------------------------------------------
if __name__ == "__main__":
    root = jax.random.PRNGKey(0)
    k_h, k_p = jax.random.split(root)
    h = jax.random.normal(k_h, (B, N, D), jnp.float32)

    layer_keys = jax.random.split(k_p, LAYERS)
    all_params = tuple(init_layer_params(k) for k in layer_keys)
    packed = pack_params(all_params)

    h_out, g_out = graph_encoder(h, packed)
    jax.block_until_ready((h_out, g_out))

    h_ref, g_ref = ref_encoder(h, all_params)
    assert h_out.shape == (B, N, D) and g_out.shape == (B, D)
    # exact softmax reciprocal now -> tighter tolerance than before
    assert jnp.allclose(h_out, h_ref, atol=1e-3, rtol=1e-3)
    assert jnp.allclose(g_out, g_ref, atol=1e-3, rtol=1e-3)

    print("KERNEL_OK")
</pallas_src>

<mosaic_0001>
module attributes {stable_mosaic.version = 11 : i64} {
  func.func @graph_encoder_kernel(%arg0: memref<2x8x128xf32, #tpu.memory_space<vmem>>, %arg1: memref<2x4x128x96xf32, #tpu.memory_space<vmem>>, %arg2: memref<2x4x32x128xf32, #tpu.memory_space<vmem>>, %arg3: memref<2x1x128xf32, #tpu.memory_space<vmem>>, %arg4: memref<2x1x128xf32, #tpu.memory_space<vmem>>, %arg5: memref<2x128x128xf32, #tpu.memory_space<vmem>>, %arg6: memref<2x1x128xf32, #tpu.memory_space<vmem>>, %arg7: memref<2x128x128xf32, #tpu.memory_space<vmem>>, %arg8: memref<2x1x128xf32, #tpu.memory_space<vmem>>, %arg9: memref<2x1x128xf32, #tpu.memory_space<vmem>>, %arg10: memref<2x1x128xf32, #tpu.memory_space<vmem>>, %arg11: memref<2x8x128xf32, #tpu.memory_space<vmem>>, %arg12: memref<2x128xf32, #tpu.memory_space<vmem>>) attributes {dimension_semantics = [], scalar_prefetch = 0 : i64, scratch_operands = 0 : i64, tpu.core_type = #tpu.core_type<tc>} {
    %c0 = arith.constant 0 : index
    %c0_0 = arith.constant 0 : index
    %c0_1 = arith.constant 0 : index
    %0 = vector.load %arg0[%c0, %c0_0, %c0_1] : memref<2x8x128xf32, #tpu.memory_space<vmem>>, vector<2x8x128xf32>
    %1 = vector.shape_cast %0 : vector<2x8x128xf32> to vector<16x128xf32>
    %2 = vector.shape_cast %1 : vector<16x128xf32> to vector<1x16x128xf32>
    %3 = vector.broadcast %2 : vector<1x16x128xf32> to vector<4x16x128xf32>
    %c0_2 = arith.constant 0 : index
    %c0_3 = arith.constant 0 : index
    %c0_4 = arith.constant 0 : index
    %c0_5 = arith.constant 0 : index
    %4 = vector.load %arg1[%c0_2, %c0_3, %c0_4, %c0_5] : memref<2x4x128x96xf32, #tpu.memory_space<vmem>>, vector<1x4x128x96xf32>
    %5 = vector.shape_cast %4 : vector<1x4x128x96xf32> to vector<4x128x96xf32>
    "tpu.trace_start"() <{level = 10 : i32, message = "hrd,hdc->hrc"}> : () -> ()
    %cst = arith.constant dense<0.000000e+00> : vector<4x16x96xf32>
    %6 = tpu.matmul %3, %5, %cst {dimension_numbers = #tpu.dot_dimension_numbers<[2], [1], [1], [2], [0, 0, 0, 1, 1, 2], [0], [0]>} : vector<4x16x128xf32>, vector<4x128x96xf32>, vector<4x16x96xf32> -> vector<4x16x96xf32>
    "tpu.trace_stop"() : () -> ()
    %7 = vector.extract_strided_slice %6 {offsets = [0, 0, 0], sizes = [4, 16, 32], strides = [1, 1, 1]} : vector<4x16x96xf32> to vector<4x16x32xf32>
    %8 = vector.shape_cast %7 : vector<4x16x32xf32> to vector<8x8x32xf32>
    %9 = vector.extract_strided_slice %6 {offsets = [0, 0, 32], sizes = [4, 16, 32], strides = [1, 1, 1]} : vector<4x16x96xf32> to vector<4x16x32xf32>
    %10 = vector.shape_cast %9 : vector<4x16x32xf32> to vector<8x8x32xf32>
    %11 = vector.extract_strided_slice %6 {offsets = [0, 0, 64], sizes = [4, 16, 32], strides = [1, 1, 1]} : vector<4x16x96xf32> to vector<4x16x32xf32>
    %12 = vector.shape_cast %11 : vector<4x16x32xf32> to vector<8x8x32xf32>
    "tpu.trace_start"() <{level = 10 : i32, message = "znk,zmk->znm"}> : () -> ()
    %cst_6 = arith.constant dense<0.000000e+00> : vector<8x8x8xf32>
    %13 = tpu.matmul %8, %10, %cst_6 {dimension_numbers = #tpu.dot_dimension_numbers<[2], [2], [1], [1], [0, 0, 0, 1, 1, 1], [0], [0]>} : vector<8x8x32xf32>, vector<8x8x32xf32>, vector<8x8x8xf32> -> vector<8x8x8xf32>
    "tpu.trace_stop"() : () -> ()
    %cst_7 = arith.constant dense<0xFF800000> : vector<8x8xf32>
    %14 = vector.multi_reduction <maximumf>, %13, %cst_7 [2] : vector<8x8x8xf32> to vector<8x8xf32>
    %15 = vector.shape_cast %14 : vector<8x8xf32> to vector<8x8x1xf32>
    %16 = vector.broadcast %15 : vector<8x8x1xf32> to vector<8x8x8xf32>
    %17 = arith.subf %13, %16 : vector<8x8x8xf32>
    %18 = math.exp %17 : vector<8x8x8xf32>
    %cst_8 = arith.constant dense<0.000000e+00> : vector<8x8xf32>
    %19 = vector.multi_reduction <add>, %18, %cst_8 [2] : vector<8x8x8xf32> to vector<8x8xf32>
    %20 = vector.shape_cast %19 : vector<8x8xf32> to vector<8x8x1xf32>
    %21 = tpu.reciprocal %20 : vector<8x8x1xf32> -> vector<8x8x1xf32>
    %22 = vector.broadcast %21 : vector<8x8x1xf32> to vector<8x8x8xf32>
    %23 = arith.mulf %18, %22 : vector<8x8x8xf32>
    "tpu.trace_start"() <{level = 10 : i32, message = "znm,zmk->znk"}> : () -> ()
    %cst_9 = arith.constant dense<0.000000e+00> : vector<8x8x32xf32>
    %24 = tpu.matmul %23, %12, %cst_9 {dimension_numbers = #tpu.dot_dimension_numbers<[2], [1], [1], [2], [0, 0, 0, 1, 1, 2], [0], [0]>} : vector<8x8x8xf32>, vector<8x8x32xf32>, vector<8x8x32xf32> -> vector<8x8x32xf32>
    "tpu.trace_stop"() : () -> ()
    %25 = vector.shape_cast %24 : vector<8x8x32xf32> to vector<4x16x32xf32>
    %c0_10 = arith.constant 0 : index
    %c0_11 = arith.constant 0 : index
    %c0_12 = arith.constant 0 : index
    %c0_13 = arith.constant 0 : index
    %26 = vector.load %arg2[%c0_10, %c0_11, %c0_12, %c0_13] : memref<2x4x32x128xf32, #tpu.memory_space<vmem>>, vector<1x4x32x128xf32>
    %27 = vector.shape_cast %26 : vector<1x4x32x128xf32> to vector<4x32x128xf32>
    "tpu.trace_start"() <{level = 10 : i32, message = "hrc,hcd->hrd"}> : () -> ()
    %cst_14 = arith.constant dense<0.000000e+00> : vector<4x16x128xf32>
    %28 = tpu.matmul %25, %27, %cst_14 {dimension_numbers = #tpu.dot_dimension_numbers<[2], [1], [1], [2], [0, 0, 0, 1, 1, 2], [0], [0]>} : vector<4x16x32xf32>, vector<4x32x128xf32>, vector<4x16x128xf32> -> vector<4x16x128xf32>
    "tpu.trace_stop"() : () -> ()
    %cst_15 = arith.constant dense<0.000000e+00> : vector<16x128xf32>
    %29 = vector.multi_reduction <add>, %28, %cst_15 [0] : vector<4x16x128xf32> to vector<16x128xf32>
    %30 = arith.addf %1, %29 : vector<16x128xf32>
    %cst_16 = arith.constant dense<0.000000e+00> : vector<128xf32>
    %31 = vector.multi_reduction <add>, %30, %cst_16 [0] : vector<16x128xf32> to vector<128xf32>
    %32 = vector.shape_cast %31 : vector<128xf32> to vector<1x128xf32>
    %cst_17 = arith.constant 1.600000e+01 : f32
    %33 = vector.broadcast %cst_17 : f32 to vector<1x128xf32>
    %34 = arith.divf %32, %33 : vector<1x128xf32>
    %35 = vector.broadcast %34 : vector<1x128xf32> to vector<16x128xf32>
    %36 = arith.subf %30, %35 : vector<16x128xf32>
    %37 = arith.mulf %36, %36 : vector<16x128xf32>
    %cst_18 = arith.constant dense<0.000000e+00> : vector<128xf32>
    %38 = vector.multi_reduction <add>, %37, %cst_18 [0] : vector<16x128xf32> to vector<128xf32>
    %39 = vector.shape_cast %38 : vector<128xf32> to vector<1x128xf32>
    %cst_19 = arith.constant 1.600000e+01 : f32
    %40 = vector.broadcast %cst_19 : f32 to vector<1x128xf32>
    %41 = arith.divf %39, %40 : vector<1x128xf32>
    %cst_20 = arith.constant 9.99999974E-6 : f32
    %42 = vector.broadcast %cst_20 : f32 to vector<1x128xf32>
    %43 = arith.addf %41, %42 : vector<1x128xf32>
    %44 = math.rsqrt %43 : vector<1x128xf32>
    %c0_21 = arith.constant 0 : index
    %c0_22 = arith.constant 0 : index
    %c0_23 = arith.constant 0 : index
    %45 = vector.load %arg3[%c0_21, %c0_22, %c0_23] : memref<2x1x128xf32, #tpu.memory_space<vmem>>, vector<1x1x128xf32>
    %46 = vector.shape_cast %45 : vector<1x1x128xf32> to vector<1x128xf32>
    %47 = arith.mulf %44, %46 : vector<1x128xf32>
    %48 = vector.broadcast %47 : vector<1x128xf32> to vector<16x128xf32>
    %49 = arith.mulf %36, %48 : vector<16x128xf32>
    %c0_24 = arith.constant 0 : index
    %c0_25 = arith.constant 0 : index
    %c0_26 = arith.constant 0 : index
    %50 = vector.load %arg4[%c0_24, %c0_25, %c0_26] : memref<2x1x128xf32, #tpu.memory_space<vmem>>, vector<1x1x128xf32>
    %51 = vector.shape_cast %50 : vector<1x1x128xf32> to vector<1x128xf32>
    %52 = vector.broadcast %51 : vector<1x128xf32> to vector<16x128xf32>
    %53 = arith.addf %49, %52 : vector<16x128xf32>
    %c0_27 = arith.constant 0 : index
    %c0_28 = arith.constant 0 : index
    %c0_29 = arith.constant 0 : index
    %54 = vector.load %arg5[%c0_27, %c0_28, %c0_29] : memref<2x128x128xf32, #tpu.memory_space<vmem>>, vector<1x128x128xf32>
    %55 = vector.shape_cast %54 : vector<1x128x128xf32> to vector<128x128xf32>
    %cst_30 = arith.constant dense<0.000000e+00> : vector<16x128xf32>
    %56 = tpu.matmul %53, %55, %cst_30 {dimension_numbers = #tpu.dot_dimension_numbers<[1], [0], [0], [1], [0, 0, 1, 1], [], []>} : vector<16x128xf32>, vector<128x128xf32>, vector<16x128xf32> -> vector<16x128xf32>
    %c0_31 = arith.constant 0 : index
    %c0_32 = arith.constant 0 : index
    %c0_33 = arith.constant 0 : index
    %57 = vector.load %arg6[%c0_31, %c0_32, %c0_33] : memref<2x1x128xf32, #tpu.memory_space<vmem>>, vector<1x1x128xf32>
    %58 = vector.shape_cast %57 : vector<1x1x128xf32> to vector<1x128xf32>
    %59 = vector.broadcast %58 : vector<1x128xf32> to vector<16x128xf32>
    %60 = arith.addf %56, %59 : vector<16x128xf32>
    %cst_34 = arith.constant 0.000000e+00 : f32
    %61 = vector.broadcast %cst_34 : f32 to vector<16x128xf32>
    %62 = arith.maximumf %60, %61 : vector<16x128xf32>
    %c0_35 = arith.constant 0 : index
    %c0_36 = arith.constant 0 : index
    %c0_37 = arith.constant 0 : index
    %63 = vector.load %arg7[%c0_35, %c0_36, %c0_37] : memref<2x128x128xf32, #tpu.memory_space<vmem>>, vector<1x128x128xf32>
    %64 = vector.shape_cast %63 : vector<1x128x128xf32> to vector<128x128xf32>
    %cst_38 = arith.constant dense<0.000000e+00> : vector<16x128xf32>
    %65 = tpu.matmul %62, %64, %cst_38 {dimension_numbers = #tpu.dot_dimension_numbers<[1], [0], [0], [1], [0, 0, 1, 1], [], []>} : vector<16x128xf32>, vector<128x128xf32>, vector<16x128xf32> -> vector<16x128xf32>
    %c0_39 = arith.constant 0 : index
    %c0_40 = arith.constant 0 : index
    %c0_41 = arith.constant 0 : index
    %66 = vector.load %arg8[%c0_39, %c0_40, %c0_41] : memref<2x1x128xf32, #tpu.memory_space<vmem>>, vector<1x1x128xf32>
    %67 = vector.shape_cast %66 : vector<1x1x128xf32> to vector<1x128xf32>
    %68 = vector.broadcast %67 : vector<1x128xf32> to vector<16x128xf32>
    %69 = arith.addf %65, %68 : vector<16x128xf32>
    %70 = arith.addf %53, %69 : vector<16x128xf32>
    %cst_42 = arith.constant dense<0.000000e+00> : vector<128xf32>
    %71 = vector.multi_reduction <add>, %70, %cst_42 [0] : vector<16x128xf32> to vector<128xf32>
    %72 = vector.shape_cast %71 : vector<128xf32> to vector<1x128xf32>
    %cst_43 = arith.constant 1.600000e+01 : f32
    %73 = vector.broadcast %cst_43 : f32 to vector<1x128xf32>
    %74 = arith.divf %72, %73 : vector<1x128xf32>
    %75 = vector.broadcast %74 : vector<1x128xf32> to vector<16x128xf32>
    %76 = arith.subf %70, %75 : vector<16x128xf32>
    %77 = arith.mulf %76, %76 : vector<16x128xf32>
    %cst_44 = arith.constant dense<0.000000e+00> : vector<128xf32>
    %78 = vector.multi_reduction <add>, %77, %cst_44 [0] : vector<16x128xf32> to vector<128xf32>
    %79 = vector.shape_cast %78 : vector<128xf32> to vector<1x128xf32>
    %cst_45 = arith.constant 1.600000e+01 : f32
    %80 = vector.broadcast %cst_45 : f32 to vector<1x128xf32>
    %81 = arith.divf %79, %80 : vector<1x128xf32>
    %cst_46 = arith.constant 9.99999974E-6 : f32
    %82 = vector.broadcast %cst_46 : f32 to vector<1x128xf32>
    %83 = arith.addf %81, %82 : vector<1x128xf32>
    %84 = math.rsqrt %83 : vector<1x128xf32>
    %c0_47 = arith.constant 0 : index
    %c0_48 = arith.constant 0 : index
    %c0_49 = arith.constant 0 : index
    %85 = vector.load %arg9[%c0_47, %c0_48, %c0_49] : memref<2x1x128xf32, #tpu.memory_space<vmem>>, vector<1x1x128xf32>
    %86 = vector.shape_cast %85 : vector<1x1x128xf32> to vector<1x128xf32>
    %87 = arith.mulf %84, %86 : vector<1x128xf32>
    %88 = vector.broadcast %87 : vector<1x128xf32> to vector<16x128xf32>
    %89 = arith.mulf %76, %88 : vector<16x128xf32>
    %c0_50 = arith.constant 0 : index
    %c0_51 = arith.constant 0 : index
    %c0_52 = arith.constant 0 : index
    %90 = vector.load %arg10[%c0_50, %c0_51, %c0_52] : memref<2x1x128xf32, #tpu.memory_space<vmem>>, vector<1x1x128xf32>
    %91 = vector.shape_cast %90 : vector<1x1x128xf32> to vector<1x128xf32>
    %92 = vector.broadcast %91 : vector<1x128xf32> to vector<16x128xf32>
    %93 = arith.addf %89, %92 : vector<16x128xf32>
    %94 = arith.addf %1, %93 : vector<16x128xf32>
    %95 = vector.shape_cast %94 : vector<16x128xf32> to vector<1x16x128xf32>
    %96 = vector.broadcast %95 : vector<1x16x128xf32> to vector<4x16x128xf32>
    %c1 = arith.constant 1 : index
    %c0_53 = arith.constant 0 : index
    %c0_54 = arith.constant 0 : index
    %c0_55 = arith.constant 0 : index
    %97 = vector.load %arg1[%c1, %c0_53, %c0_54, %c0_55] : memref<2x4x128x96xf32, #tpu.memory_space<vmem>>, vector<1x4x128x96xf32>
    %98 = vector.shape_cast %97 : vector<1x4x128x96xf32> to vector<4x128x96xf32>
    "tpu.trace_start"() <{level = 10 : i32, message = "hrd,hdc->hrc"}> : () -> ()
    %cst_56 = arith.constant dense<0.000000e+00> : vector<4x16x96xf32>
    %99 = tpu.matmul %96, %98, %cst_56 {dimension_numbers = #tpu.dot_dimension_numbers<[2], [1], [1], [2], [0, 0, 0, 1, 1, 2], [0], [0]>} : vector<4x16x128xf32>, vector<4x128x96xf32>, vector<4x16x96xf32> -> vector<4x16x96xf32>
    "tpu.trace_stop"() : () -> ()
    %100 = vector.extract_strided_slice %99 {offsets = [0, 0, 0], sizes = [4, 16, 32], strides = [1, 1, 1]} : vector<4x16x96xf32> to vector<4x16x32xf32>
    %101 = vector.shape_cast %100 : vector<4x16x32xf32> to vector<8x8x32xf32>
    %102 = vector.extract_strided_slice %99 {offsets = [0, 0, 32], sizes = [4, 16, 32], strides = [1, 1, 1]} : vector<4x16x96xf32> to vector<4x16x32xf32>
    %103 = vector.shape_cast %102 : vector<4x16x32xf32> to vector<8x8x32xf32>
    %104 = vector.extract_strided_slice %99 {offsets = [0, 0, 64], sizes = [4, 16, 32], strides = [1, 1, 1]} : vector<4x16x96xf32> to vector<4x16x32xf32>
    %105 = vector.shape_cast %104 : vector<4x16x32xf32> to vector<8x8x32xf32>
    "tpu.trace_start"() <{level = 10 : i32, message = "znk,zmk->znm"}> : () -> ()
    %cst_57 = arith.constant dense<0.000000e+00> : vector<8x8x8xf32>
    %106 = tpu.matmul %101, %103, %cst_57 {dimension_numbers = #tpu.dot_dimension_numbers<[2], [2], [1], [1], [0, 0, 0, 1, 1, 1], [0], [0]>} : vector<8x8x32xf32>, vector<8x8x32xf32>, vector<8x8x8xf32> -> vector<8x8x8xf32>
    "tpu.trace_stop"() : () -> ()
    %cst_58 = arith.constant dense<0xFF800000> : vector<8x8xf32>
    %107 = vector.multi_reduction <maximumf>, %106, %cst_58 [2] : vector<8x8x8xf32> to vector<8x8xf32>
    %108 = vector.shape_cast %107 : vector<8x8xf32> to vector<8x8x1xf32>
    %109 = vector.broadcast %108 : vector<8x8x1xf32> to vector<8x8x8xf32>
    %110 = arith.subf %106, %109 : vector<8x8x8xf32>
    %111 = math.exp %110 : vector<8x8x8xf32>
    %cst_59 = arith.constant dense<0.000000e+00> : vector<8x8xf32>
    %112 = vector.multi_reduction <add>, %111, %cst_59 [2] : vector<8x8x8xf32> to vector<8x8xf32>
    %113 = vector.shape_cast %112 : vector<8x8xf32> to vector<8x8x1xf32>
    %114 = tpu.reciprocal %113 : vector<8x8x1xf32> -> vector<8x8x1xf32>
    %115 = vector.broadcast %114 : vector<8x8x1xf32> to vector<8x8x8xf32>
    %116 = arith.mulf %111, %115 : vector<8x8x8xf32>
    "tpu.trace_start"() <{level = 10 : i32, message = "znm,zmk->znk"}> : () -> ()
    %cst_60 = arith.constant dense<0.000000e+00> : vector<8x8x32xf32>
    %117 = tpu.matmul %116, %105, %cst_60 {dimension_numbers = #tpu.dot_dimension_numbers<[2], [1], [1], [2], [0, 0, 0, 1, 1, 2], [0], [0]>} : vector<8x8x8xf32>, vector<8x8x32xf32>, vector<8x8x32xf32> -> vector<8x8x32xf32>
    "tpu.trace_stop"() : () -> ()
    %118 = vector.shape_cast %117 : vector<8x8x32xf32> to vector<4x16x32xf32>
    %c1_61 = arith.constant 1 : index
    %c0_62 = arith.constant 0 : index
    %c0_63 = arith.constant 0 : index
    %c0_64 = arith.constant 0 : index
    %119 = vector.load %arg2[%c1_61, %c0_62, %c0_63, %c0_64] : memref<2x4x32x128xf32, #tpu.memory_space<vmem>>, vector<1x4x32x128xf32>
    %120 = vector.shape_cast %119 : vector<1x4x32x128xf32> to vector<4x32x128xf32>
    "tpu.trace_start"() <{level = 10 : i32, message = "hrc,hcd->hrd"}> : () -> ()
    %cst_65 = arith.constant dense<0.000000e+00> : vector<4x16x128xf32>
    %121 = tpu.matmul %118, %120, %cst_65 {dimension_numbers = #tpu.dot_dimension_numbers<[2], [1], [1], [2], [0, 0, 0, 1, 1, 2], [0], [0]>} : vector<4x16x32xf32>, vector<4x32x128xf32>, vector<4x16x128xf32> -> vector<4x16x128xf32>
    "tpu.trace_stop"() : () -> ()
    %cst_66 = arith.constant dense<0.000000e+00> : vector<16x128xf32>
    %122 = vector.multi_reduction <add>, %121, %cst_66 [0] : vector<4x16x128xf32> to vector<16x128xf32>
    %123 = arith.addf %94, %122 : vector<16x128xf32>
    %cst_67 = arith.constant dense<0.000000e+00> : vector<128xf32>
    %124 = vector.multi_reduction <add>, %123, %cst_67 [0] : vector<16x128xf32> to vector<128xf32>
    %125 = vector.shape_cast %124 : vector<128xf32> to vector<1x128xf32>
    %cst_68 = arith.constant 1.600000e+01 : f32
    %126 = vector.broadcast %cst_68 : f32 to vector<1x128xf32>
    %127 = arith.divf %125, %126 : vector<1x128xf32>
    %128 = vector.broadcast %127 : vector<1x128xf32> to vector<16x128xf32>
    %129 = arith.subf %123, %128 : vector<16x128xf32>
    %130 = arith.mulf %129, %129 : vector<16x128xf32>
    %cst_69 = arith.constant dense<0.000000e+00> : vector<128xf32>
    %131 = vector.multi_reduction <add>, %130, %cst_69 [0] : vector<16x128xf32> to vector<128xf32>
    %132 = vector.shape_cast %131 : vector<128xf32> to vector<1x128xf32>
    %cst_70 = arith.constant 1.600000e+01 : f32
    %133 = vector.broadcast %cst_70 : f32 to vector<1x128xf32>
    %134 = arith.divf %132, %133 : vector<1x128xf32>
    %cst_71 = arith.constant 9.99999974E-6 : f32
    %135 = vector.broadcast %cst_71 : f32 to vector<1x128xf32>
    %136 = arith.addf %134, %135 : vector<1x128xf32>
    %137 = math.rsqrt %136 : vector<1x128xf32>
    %c1_72 = arith.constant 1 : index
    %c0_73 = arith.constant 0 : index
    %c0_74 = arith.constant 0 : index
    %138 = vector.load %arg3[%c1_72, %c0_73, %c0_74] : memref<2x1x128xf32, #tpu.memory_space<vmem>>, vector<1x1x128xf32>
    %139 = vector.shape_cast %138 : vector<1x1x128xf32> to vector<1x128xf32>
    %140 = arith.mulf %137, %139 : vector<1x128xf32>
    %141 = vector.broadcast %140 : vector<1x128xf32> to vector<16x128xf32>
    %142 = arith.mulf %129, %141 : vector<16x128xf32>
    %c1_75 = arith.constant 1 : index
    %c0_76 = arith.constant 0 : index
    %c0_77 = arith.constant 0 : index
    %143 = vector.load %arg4[%c1_75, %c0_76, %c0_77] : memref<2x1x128xf32, #tpu.memory_space<vmem>>, vector<1x1x128xf32>
    %144 = vector.shape_cast %143 : vector<1x1x128xf32> to vector<1x128xf32>
    %145 = vector.broadcast %144 : vector<1x128xf32> to vector<16x128xf32>
    %146 = arith.addf %142, %145 : vector<16x128xf32>
    %c1_78 = arith.constant 1 : index
    %c0_79 = arith.constant 0 : index
    %c0_80 = arith.constant 0 : index
    %147 = vector.load %arg5[%c1_78, %c0_79, %c0_80] : memref<2x128x128xf32, #tpu.memory_space<vmem>>, vector<1x128x128xf32>
    %148 = vector.shape_cast %147 : vector<1x128x128xf32> to vector<128x128xf32>
    %cst_81 = arith.constant dense<0.000000e+00> : vector<16x128xf32>
    %149 = tpu.matmul %146, %148, %cst_81 {dimension_numbers = #tpu.dot_dimension_numbers<[1], [0], [0], [1], [0, 0, 1, 1], [], []>} : vector<16x128xf32>, vector<128x128xf32>, vector<16x128xf32> -> vector<16x128xf32>
    %c1_82 = arith.constant 1 : index
    %c0_83 = arith.constant 0 : index
    %c0_84 = arith.constant 0 : index
    %150 = vector.load %arg6[%c1_82, %c0_83, %c0_84] : memref<2x1x128xf32, #tpu.memory_space<vmem>>, vector<1x1x128xf32>
    %151 = vector.shape_cast %150 : vector<1x1x128xf32> to vector<1x128xf32>
    %152 = vector.broadcast %151 : vector<1x128xf32> to vector<16x128xf32>
    %153 = arith.addf %149, %152 : vector<16x128xf32>
    %cst_85 = arith.constant 0.000000e+00 : f32
    %154 = vector.broadcast %cst_85 : f32 to vector<16x128xf32>
    %155 = arith.maximumf %153, %154 : vector<16x128xf32>
    %c1_86 = arith.constant 1 : index
    %c0_87 = arith.constant 0 : index
    %c0_88 = arith.constant 0 : index
    %156 = vector.load %arg7[%c1_86, %c0_87, %c0_88] : memref<2x128x128xf32, #tpu.memory_space<vmem>>, vector<1x128x128xf32>
    %157 = vector.shape_cast %156 : vector<1x128x128xf32> to vector<128x128xf32>
    %cst_89 = arith.constant dense<0.000000e+00> : vector<16x128xf32>
    %158 = tpu.matmul %155, %157, %cst_89 {dimension_numbers = #tpu.dot_dimension_numbers<[1], [0], [0], [1], [0, 0, 1, 1], [], []>} : vector<16x128xf32>, vector<128x128xf32>, vector<16x128xf32> -> vector<16x128xf32>
    %c1_90 = arith.constant 1 : index
    %c0_91 = arith.constant 0 : index
    %c0_92 = arith.constant 0 : index
    %159 = vector.load %arg8[%c1_90, %c0_91, %c0_92] : memref<2x1x128xf32, #tpu.memory_space<vmem>>, vector<1x1x128xf32>
    %160 = vector.shape_cast %159 : vector<1x1x128xf32> to vector<1x128xf32>
    %161 = vector.broadcast %160 : vector<1x128xf32> to vector<16x128xf32>
    %162 = arith.addf %158, %161 : vector<16x128xf32>
    %163 = arith.addf %146, %162 : vector<16x128xf32>
    %cst_93 = arith.constant dense<0.000000e+00> : vector<128xf32>
    %164 = vector.multi_reduction <add>, %163, %cst_93 [0] : vector<16x128xf32> to vector<128xf32>
    %165 = vector.shape_cast %164 : vector<128xf32> to vector<1x128xf32>
    %cst_94 = arith.constant 1.600000e+01 : f32
    %166 = vector.broadcast %cst_94 : f32 to vector<1x128xf32>
    %167 = arith.divf %165, %166 : vector<1x128xf32>
    %168 = vector.broadcast %167 : vector<1x128xf32> to vector<16x128xf32>
    %169 = arith.subf %163, %168 : vector<16x128xf32>
    %170 = arith.mulf %169, %169 : vector<16x128xf32>
    %cst_95 = arith.constant dense<0.000000e+00> : vector<128xf32>
    %171 = vector.multi_reduction <add>, %170, %cst_95 [0] : vector<16x128xf32> to vector<128xf32>
    %172 = vector.shape_cast %171 : vector<128xf32> to vector<1x128xf32>
    %cst_96 = arith.constant 1.600000e+01 : f32
    %173 = vector.broadcast %cst_96 : f32 to vector<1x128xf32>
    %174 = arith.divf %172, %173 : vector<1x128xf32>
    %cst_97 = arith.constant 9.99999974E-6 : f32
    %175 = vector.broadcast %cst_97 : f32 to vector<1x128xf32>
    %176 = arith.addf %174, %175 : vector<1x128xf32>
    %177 = math.rsqrt %176 : vector<1x128xf32>
    %c1_98 = arith.constant 1 : index
    %c0_99 = arith.constant 0 : index
    %c0_100 = arith.constant 0 : index
    %178 = vector.load %arg9[%c1_98, %c0_99, %c0_100] : memref<2x1x128xf32, #tpu.memory_space<vmem>>, vector<1x1x128xf32>
    %179 = vector.shape_cast %178 : vector<1x1x128xf32> to vector<1x128xf32>
    %180 = arith.mulf %177, %179 : vector<1x128xf32>
    %181 = vector.broadcast %180 : vector<1x128xf32> to vector<16x128xf32>
    %182 = arith.mulf %169, %181 : vector<16x128xf32>
    %c1_101 = arith.constant 1 : index
    %c0_102 = arith.constant 0 : index
    %c0_103 = arith.constant 0 : index
    %183 = vector.load %arg10[%c1_101, %c0_102, %c0_103] : memref<2x1x128xf32, #tpu.memory_space<vmem>>, vector<1x1x128xf32>
    %184 = vector.shape_cast %183 : vector<1x1x128xf32> to vector<1x128xf32>
    %185 = vector.broadcast %184 : vector<1x128xf32> to vector<16x128xf32>
    %186 = arith.addf %182, %185 : vector<16x128xf32>
    %187 = arith.addf %94, %186 : vector<16x128xf32>
    %188 = vector.shape_cast %187 : vector<16x128xf32> to vector<2x8x128xf32>
    %c0_104 = arith.constant 0 : index
    %c0_105 = arith.constant 0 : index
    %c0_106 = arith.constant 0 : index
    %189 = vector.load %arg11[%c0_104, %c0_105, %c0_106] : memref<2x8x128xf32, #tpu.memory_space<vmem>>, vector<2x8x128xf32>
    tpu.vector_store %arg11[%c0_104, %c0_105, %c0_106], %188 {strides = array<i32>} : memref<2x8x128xf32, #tpu.memory_space<vmem>>, vector<2x8x128xf32>,
    %cst_107 = arith.constant dense<0.000000e+00> : vector<2x128xf32>
    %190 = vector.multi_reduction <add>, %188, %cst_107 [1] : vector<2x8x128xf32> to vector<2x128xf32>
    %cst_108 = arith.constant 8.000000e+00 : f32
    %191 = vector.broadcast %cst_108 : f32 to vector<2x128xf32>
    %192 = arith.divf %190, %191 : vector<2x128xf32>
    %c0_109 = arith.constant 0 : index
    %c0_110 = arith.constant 0 : index
    %193 = vector.load %arg12[%c0_109, %c0_110] : memref<2x128xf32, #tpu.memory_space<vmem>>, vector<2x128xf32>
    tpu.vector_store %arg12[%c0_109, %c0_110], %192 {strides = array<i32>} : memref<2x128xf32, #tpu.memory_space<vmem>>, vector<2x128xf32>,
    return
  }
}

</mosaic_0001>

<bundles_post_ra>
// kernel: graph_encoder.1
= control target key start
LH: loop header
LB: loop body
LE: loop exit
PB: predicated region body
PF: predicated region fallthrough
CT: control target
= control target key end

     0   :  { %18 = vsyncpa [#allocation3], 0  ;;  %s7216_s0 = inlined_call_operand.vmem [shape: f32[2,8,128], index: 0, kind: input, shape index: {}]   ;;  %s7217_s1 = inlined_call_operand.vmem [shape: f32[2,4,128,96], index: 1, kind: input, shape index: {}]   ;;  %s7218_s2 = inlined_call_operand.vmem [shape: f32[2,4,32,128], index: 2, kind: input, shape index: {}]   ;;  %s7219_s3 = inlined_call_operand.vmem [shape: f32[2,1,128], index: 3, kind: input, shape index: {}]   ;;  %s7220_s4 = inlined_call_operand.vmem [shape: f32[2,1,128], index: 4, kind: input, shape index: {}]   ;;  %s7221_s5 = inlined_call_operand.vmem [shape: f32[2,128,128], index: 5, kind: input, shape index: {}]   ;;  %s7222_s6 = inlined_call_operand.vmem [shape: f32[2,1,128], index: 6, kind: input, shape index: {}]   ;;  %s7223_s7 = inlined_call_operand.vmem [shape: f32[2,128,128], index: 7, kind: input, shape index: {}]   ;;  %s7224_s8 = inlined_call_operand.vmem [shape: f32[2,1,128], index: 8, kind: input, shape index: {}]   ;;  %s7225_s9 = inlined_call_operand.vmem [shape: f32[2,1,128], index: 9, kind: input, shape index: {}]   ;;  %s7226_s10 = inlined_call_operand.vmem [shape: f32[2,1,128], index: 10, kind: input, shape index: {}]   ;;  %s7227_s11 = inlined_call_operand.hbm [shape: f32[2,8,128], index: 11, kind: output, shape index: {0}]   ;;  %s7228_s12 = inlined_call_operand.hbm [shape: f32[2,128], index: 12, kind: output, shape index: {1}]  }
   0x1   :  { %v59_v0 = vld [vmem:[%s7217_s1 + $0x78] sm:$0xff]  ;;  %v58_v2 = vld [vmem:[%s7217_s1 + $0x70] sm:$0xff]  ;;  %v57_v4 = vld [vmem:[%s7217_s1 + $0x68] sm:$0xff] }
   0x2   :  { %v75_v1 = vld [vmem:[%s7217_s1 + $0xf8] sm:$0xff]  ;;  %5236 = vmatprep.subr.mxu0 %v59_v0  ;;  %v74_v3 = vld [vmem:[%s7217_s1 + $0xf0] sm:$0xff]  ;;  %v73_v5 = vld [vmem:[%s7217_s1 + $0xe8] sm:$0xff] }
   0x3   :  { %5271 = vmatprep.subr.mxu1 %v75_v1  ;;  %5237 = vmatpush3.msra.mxu0 %v59_v0  ;;  %v56_v6 = vld [vmem:[%s7217_s1 + $0x60] sm:$0xff]  ;;  %v55_v8 = vld [vmem:[%s7217_s1 + $0x58] sm:$0xff]  ;;  %v54_v10 = vld [vmem:[%s7217_s1 + $0x50] sm:$0xff] }
   0x4   :  { %5272 = vmatpush3.msra.mxu1 %v75_v1  ;;  %5238 = vmatprep.subr.mxu0 %v58_v2  ;;  %v72_v7 = vld [vmem:[%s7217_s1 + $0xe0] sm:$0xff]  ;;  %v71_v9 = vld [vmem:[%s7217_s1 + $0xd8] sm:$0xff]  ;;  %v70_v11 = vld [vmem:[%s7217_s1 + $0xd0] sm:$0xff] }
   0x5   :  { %5273 = vmatprep.subr.mxu1 %v74_v3  ;;  %5239 = vmatpush3.msra.mxu0 %v58_v2  ;;  %v53_v12 = vld [vmem:[%s7217_s1 + $0x48] sm:$0xff]  ;;  %v52_v14 = vld [vmem:[%s7217_s1 + $0x40] sm:$0xff]  ;;  %v51_v16 = vld [vmem:[%s7217_s1 + $0x38] sm:$0xff] }
   0x6   :  { %5274 = vmatpush3.msra.mxu1 %v74_v3  ;;  %5240 = vmatprep.subr.mxu0 %v57_v4  ;;  %v69_v13 = vld [vmem:[%s7217_s1 + $0xc8] sm:$0xff]  ;;  %v68_v15 = vld [vmem:[%s7217_s1 + $0xc0] sm:$0xff]  ;;  %v67_v17 = vld [vmem:[%s7217_s1 + $0xb8] sm:$0xff] }
   0x7   :  { %5275 = vmatprep.subr.mxu1 %v73_v5  ;;  %5241 = vmatpush3.msra.mxu0 %v57_v4  ;;  %v50_v18 = vld [vmem:[%s7217_s1 + $0x30] sm:$0xff]  ;;  %v49_v20 = vld [vmem:[%s7217_s1 + $0x28] sm:$0xff]  ;;  %v48_v22 = vld [vmem:[%s7217_s1 + $0x20] sm:$0xff] }
   0x8   :  { %5276 = vmatpush3.msra.mxu1 %v73_v5  ;;  %5242 = vmatprep.subr.mxu0 %v56_v6  ;;  %v66_v19 = vld [vmem:[%s7217_s1 + $0xb0] sm:$0xff]  ;;  %v65_v21 = vld [vmem:[%s7217_s1 + $0xa8] sm:$0xff]  ;;  %v64_v23 = vld [vmem:[%s7217_s1 + $0xa0] sm:$0xff] }
   0x9   :  { %5277 = vmatprep.subr.mxu1 %v72_v7  ;;  %5243 = vmatpush3.msra.mxu0 %v56_v6  ;;  %v47_v24 = vld [vmem:[%s7217_s1 + $0x18] sm:$0xff] }
   0xa   :  { %5278 = vmatpush3.msra.mxu1 %v72_v7  ;;  %5244 = vmatprep.subr.mxu0 %v55_v8  ;;  %v63_v25 = vld [vmem:[%s7217_s1 + $0x98] sm:$0xff] }
   0xb   :  { %5279 = vmatprep.subr.mxu1 %v71_v9  ;;  %5245 = vmatpush3.msra.mxu0 %v55_v8 }
   0xc   :  { %5280 = vmatpush3.msra.mxu1 %v71_v9  ;;  %5246 = vmatprep.subr.mxu0 %v54_v10 }
   0xd   :  { %5281 = vmatprep.subr.mxu1 %v70_v11  ;;  %5247 = vmatpush3.msra.mxu0 %v54_v10 }
   0xe   :  { %5282 = vmatpush3.msra.mxu1 %v70_v11  ;;  %5248 = vmatprep.subr.mxu0 %v53_v12 }
   0xf   :  { %5283 = vmatprep.subr.mxu1 %v69_v13  ;;  %5249 = vmatpush3.msra.mxu0 %v53_v12 }
  0x10   :  { %5284 = vmatpush3.msra.mxu1 %v69_v13  ;;  %5250 = vmatprep.subr.mxu0 %v52_v14 }
  0x11   :  { %5285 = vmatprep.subr.mxu1 %v68_v15  ;;  %5251 = vmatpush3.msra.mxu0 %v52_v14 }
  0x12   :  { %5286 = vmatpush3.msra.mxu1 %v68_v15  ;;  %5252 = vmatprep.subr.mxu0 %v51_v16 }
  0x13   :  { %5287 = vmatprep.subr.mxu1 %v67_v17  ;;  %5253 = vmatpush3.msra.mxu0 %v51_v16 }
  0x14   :  { %5288 = vmatpush3.msra.mxu1 %v67_v17  ;;  %5254 = vmatprep.subr.mxu0 %v50_v18 }
  0x15   :  { %5289 = vmatprep.subr.mxu1 %v66_v19  ;;  %5255 = vmatpush3.msra.mxu0 %v50_v18 }
  0x16   :  { %5290 = vmatpush3.msra.mxu1 %v66_v19  ;;  %5256 = vmatprep.subr.mxu0 %v49_v20 }
  0x17   :  { %5291 = vmatprep.subr.mxu1 %v65_v21  ;;  %5257 = vmatpush3.msra.mxu0 %v49_v20 }
  0x18   :  { %5292 = vmatpush3.msra.mxu1 %v65_v21 }
  0x19   :  { %19 = vsyncpa [#allocation5], 0  ;;  %5258 = vmatprep.subr.mxu0 %v48_v22  ;;  %5293 = vmatprep.subr.mxu1 %v64_v23  ;;  %v46_v26 = vld [vmem:[%s7217_s1 + $0x10] sm:$0xff]  ;;  %v45_v28 = vld [vmem:[%s7217_s1 + $0x8] sm:$0xff]  ;;  %v6030_v2 = vmov 0.0   ;;  %vm6031_vm0 = vmmov 0  }
  0x1a   :  { %5259 = vmatpush3.msra.mxu0 %v48_v22  ;;  %5294 = vmatpush3.msra.mxu1 %v64_v23  ;;  %v62_v27 = vld [vmem:[%s7217_s1 + $0x90] sm:$0xff]  ;;  %v61_v29 = vld [vmem:[%s7217_s1 + $0x88] sm:$0xff]  ;;  %v44_v30 = vld [vmem:[%s7217_s1] sm:$0xff]  ;;  %s6032_s27 = smov 96   ;;  %vm411_vm1 = vcmask 261120   ;;  %vm1025_vm2 = vcmask 64512  }
  0x1b   :  { %5260 = vmatprep.subr.mxu0 %v47_v24  ;;  %5295 = vmatprep.subr.mxu1 %v63_v25  ;;  %v60_v31 = vld [vmem:[%s7217_s1 + $0x80] sm:$0xff]  ;;  %v6207_v33 = vld [vmem:[%s7216_s0 + $0x8] sm:$0xff]  ;;  %v91_v34 = vld [vmem:[%s7217_s1 + $0x178] sm:$0xff]  ;;  %s6033_s28 = smov 64   ;;  %s6034_s20 = smov [#allocation2]  }
  0x1c   :  { %5261 = vmatpush3.msra.mxu0 %v47_v24  ;;  %5296 = vmatpush3.msra.mxu1 %v63_v25  ;;  %v6202_v32 = vld [vmem:[%s7216_s0] sm:$0xff]  ;;  %v107_v35 = vld [vmem:[%s7217_s1 + $0x1f8] sm:$0xff]  ;;  %v90_v36 = vld [vmem:[%s7217_s1 + $0x170] sm:$0xff]  ;;  %s4693_s21 = sshll.u32 %s6034_s20, 4  ;;  %s4694_s21 = int_to_ptr.vmem [resolvable:$true] %s4693_s21 }
  0x1d   :  { %5262 = vmatprep.subr.mxu0 %v46_v26  ;;  %5297 = vmatprep.subr.mxu1 %v62_v27  ;;  %v106_v37 = vld [vmem:[%s7217_s1 + $0x1f0] sm:$0xff]  ;;  %v89_v38 = vld [vmem:[%s7217_s1 + $0x168] sm:$0xff]  ;;  %v88_v40 = vld [vmem:[%s7217_s1 + $0x160] sm:$0xff]  ;;  %p5991_p1 = scmp.lt.s32.totalorder %s4694_s21, %s4694_s21 }
  0x1e   :  { %5263 = vmatpush3.msra.mxu0 %v46_v26  ;;  %5298 = vmatpush3.msra.mxu1 %v62_v27  ;;  %v105_v39 = vld [vmem:[%s7217_s1 + $0x1e8] sm:$0xff]  ;;  %v104_v41 = vld [vmem:[%s7217_s1 + $0x1e0] sm:$0xff]  ;;  %v87_v42 = vld [vmem:[%s7217_s1 + $0x158] sm:$0xff] }
  0x1f   :  { %5264 = vmatprep.subr.mxu0 %v45_v28  ;;  %5299 = vmatprep.subr.mxu1 %v61_v29  ;;  %v103_v43 = vld [vmem:[%s7217_s1 + $0x1d8] sm:$0xff]  ;;  %v86_v44 = vld [vmem:[%s7217_s1 + $0x150] sm:$0xff]  ;;  %v85_v46 = vld [vmem:[%s7217_s1 + $0x148] sm:$0xff] }
  0x20   :  { %5265 = vmatpush3.msra.mxu0 %v45_v28  ;;  %5300 = vmatpush3.msra.mxu1 %v61_v29  ;;  %v102_v45 = vld [vmem:[%s7217_s1 + $0x1d0] sm:$0xff]  ;;  %v101_v47 = vld [vmem:[%s7217_s1 + $0x1c8] sm:$0xff]  ;;  %v84_v48 = vld [vmem:[%s7217_s1 + $0x140] sm:$0xff] }
  0x21   :  { %5266 = vmatprep.subr.mxu0 %v44_v30  ;;  %5301 = vmatprep.subr.mxu1 %v60_v31  ;;  %v100_v49 = vld [vmem:[%s7217_s1 + $0x1c0] sm:$0xff]  ;;  %v83_v50 = vld [vmem:[%s7217_s1 + $0x138] sm:$0xff]  ;;  %v82_v52 = vld [vmem:[%s7217_s1 + $0x130] sm:$0xff] }
  0x22   :  { %5267 = vmatpush3.msra.mxu0 %v44_v30  ;;  %5268 = vmatprep.mubr.f32.mxu0 %v6202_v32  ;;  %v99_v51 = vld [vmem:[%s7217_s1 + $0x1b8] sm:$0xff]  ;;  %v98_v53 = vld [vmem:[%s7217_s1 + $0x1b0] sm:$0xff]  ;;  %v81_v54 = vld [vmem:[%s7217_s1 + $0x128] sm:$0xff] }
  0x23   :  { %5302 = vmatpush3.msra.mxu1 %v60_v31  ;;  %5303 = vmatprep.mubr.f32.mxu1 %v6202_v32  ;;  %v97_v55 = vld [vmem:[%s7217_s1 + $0x1a8] sm:$0xff]  ;;  %v80_v56 = vld [vmem:[%s7217_s1 + $0x120] sm:$0xff]  ;;  %v79_v58 = vld [vmem:[%s7217_s1 + $0x118] sm:$0xff] }
  0x24   :  { %5269 = vmatmul.mubr.f32.vlgmr.msra.gmra.mxu0 %v6207_v33  ;;  %5304 = vmatmul.mubr.f32.vlgmr.msra.gmra.mxu1 %v6207_v33  ;;  %v96_v57 = vld [vmem:[%s7217_s1 + $0x1a0] sm:$0xff]  ;;  %v95_v59 = vld [vmem:[%s7217_s1 + $0x198] sm:$0xff]  ;;  %v78_v60 = vld [vmem:[%s7217_s1 + $0x110] sm:$0xff] }
  0x25   :  { %5306 = vmatprep.subr.mxu0 %v91_v34  ;;  %5341 = vmatprep.subr.mxu1 %v107_v35  ;;  %v94_v61 = vld [vmem:[%s7217_s1 + $0x190] sm:$0xff]  ;;  %v77_v62 = vld [vmem:[%s7217_s1 + $0x108] sm:$0xff]  ;;  %v76_v0 = vld [vmem:[%s7217_s1 + $0x100] sm:$0xff] }
  0x26   :  { %5307 = vmatpush3.msra.mxu0 %v91_v34  ;;  %5342 = vmatpush3.msra.mxu1 %v107_v35  ;;  %v93_v63 = vld [vmem:[%s7217_s1 + $0x188] sm:$0xff]  ;;  %v92_v1 = vld [vmem:[%s7217_s1 + $0x180] sm:$0xff] }
  0x27   :  { %5308 = vmatprep.subr.mxu0 %v90_v36  ;;  %5343 = vmatprep.subr.mxu1 %v106_v37 }
  0x28   :  { %5309 = vmatpush3.msra.mxu0 %v90_v36  ;;  %5344 = vmatpush3.msra.mxu1 %v106_v37 }
  0x29   :  { %5310 = vmatprep.subr.mxu0 %v89_v38  ;;  %5345 = vmatprep.subr.mxu1 %v105_v39 }
  0x2a   :  { %5311 = vmatpush3.msra.mxu0 %v89_v38  ;;  %5346 = vmatpush3.msra.mxu1 %v105_v39 }
  0x2b   :  { %5312 = vmatprep.subr.mxu0 %v88_v40  ;;  %5347 = vmatprep.subr.mxu1 %v104_v41 }
  0x2c   :  { %5313 = vmatpush3.msra.mxu0 %v88_v40  ;;  %5348 = vmatpush3.msra.mxu1 %v104_v41 }
  0x2d   :  { %5314 = vmatprep.subr.mxu0 %v87_v42  ;;  %5349 = vmatprep.subr.mxu1 %v103_v43 }
  0x2e   :  { %5315 = vmatpush3.msra.mxu0 %v87_v42  ;;  %5350 = vmatpush3.msra.mxu1 %v103_v43 }
  0x2f   :  { %5316 = vmatprep.subr.mxu0 %v86_v44  ;;  %5351 = vmatprep.subr.mxu1 %v102_v45 }
  0x30   :  { %5317 = vmatpush3.msra.mxu0 %v86_v44  ;;  %5352 = vmatpush3.msra.mxu1 %v102_v45 }
  0x31   :  { %5318 = vmatprep.subr.mxu0 %v85_v46  ;;  %5353 = vmatprep.subr.mxu1 %v101_v47 }
  0x32   :  { %5319 = vmatpush3.msra.mxu0 %v85_v46  ;;  %5354 = vmatpush3.msra.mxu1 %v101_v47 }
  0x33   :  { %5320 = vmatprep.subr.mxu0 %v84_v48  ;;  %5355 = vmatprep.subr.mxu1 %v100_v49 }
  0x34   :  { %5321 = vmatpush3.msra.mxu0 %v84_v48  ;;  %5356 = vmatpush3.msra.mxu1 %v100_v49 }
  0x35   :  { %5322 = vmatprep.subr.mxu0 %v83_v50  ;;  %5357 = vmatprep.subr.mxu1 %v99_v51 }
  0x36   :  { %5323 = vmatpush3.msra.mxu0 %v83_v50  ;;  %5358 = vmatpush3.msra.mxu1 %v99_v51 }
  0x37   :  { %5324 = vmatprep.subr.mxu0 %v82_v52  ;;  %5359 = vmatprep.subr.mxu1 %v98_v53 }
  0x38   :  { %5325 = vmatpush3.msra.mxu0 %v82_v52  ;;  %5360 = vmatpush3.msra.mxu1 %v98_v53 }
  0x39   :  { %5326 = vmatprep.subr.mxu0 %v81_v54  ;;  %5361 = vmatprep.subr.mxu1 %v97_v55 }
  0x3a   :  { %5327 = vmatpush3.msra.mxu0 %v81_v54  ;;  %5362 = vmatpush3.msra.mxu1 %v97_v55 }
  0x3b   :  { %5328 = vmatprep.subr.mxu0 %v80_v56  ;;  %5363 = vmatprep.subr.mxu1 %v96_v57 }
  0x3c   :  { %5329 = vmatpush3.msra.mxu0 %v80_v56  ;;  %5364 = vmatpush3.msra.mxu1 %v96_v57 }
  0x3d   :  { %5330 = vmatprep.subr.mxu0 %v79_v58  ;;  %5365 = vmatprep.subr.mxu1 %v95_v59 }
  0x3e   :  { %5331 = vmatpush3.msra.mxu0 %v79_v58  ;;  %5366 = vmatpush3.msra.mxu1 %v95_v59 }
  0x3f   :  { %5332 = vmatprep.subr.mxu0 %v78_v60  ;;  %5367 = vmatprep.subr.mxu1 %v94_v61 }
  0x40   :  { %5333 = vmatpush3.msra.mxu0 %v78_v60  ;;  %5368 = vmatpush3.msra.mxu1 %v94_v61 }
  0x41   :  { %5334 = vmatprep.subr.mxu0 %v77_v62  ;;  %5369 = vmatprep.subr.mxu1 %v93_v63 }
  0x42   :  { %5335 = vmatpush3.msra.mxu0 %v77_v62  ;;  %5338 = vmatprep.mubr.f32.mxu0 %v6202_v32 }
  0x43   :  { %5336 = vmatprep.subr.mxu0 %v76_v0  ;;  %5370 = vmatpush3.msra.mxu1 %v93_v63 }
  0x44   :  { %5337 = vmatpush3.msra.mxu0 %v76_v0  ;;  %5371 = vmatprep.subr.mxu1 %v92_v1 }
  0x45   :  { %5339 = vmatmul.mubr.f32.vlgmr.msra.gmra.mxu0 %v6207_v33  ;;  %5372 = vmatpush3.msra.mxu1 %v92_v1 }
  0x46   :  { %5373 = vmatprep.mubr.f32.mxu1 %v6202_v32  ;;  %5376 = vmatprep.subr.mxu0 %v6030_v2 }
  0x47   :  { %5374 = vmatmul.mubr.f32.vlgmr.msra.gmra.mxu1 %v6207_v33  ;;  %5381 = vmatprep.subr.mxu1 %v6030_v2 }
  0x48   :  { %5378 = vmatprep.mubr.msk.f32.mxu0 %vm6031_vm0, %v6030_v2  ;;  %5383 = vmatprep.mubr.msk.f32.mxu1 %vm6031_vm0, %v6030_v2 }
  0xe4   :  { %v6319_v3 = vpop.f32.mrf.mxu0  ;;  %v6321_v4 = vpop.f32.mrf.mxu1 }
  0xe6   :  { %v6323_v5 = vpop.f32.mrf.mxu0  ;;  %v6325_v6 = vpop.f32.mrf.mxu1 }
  0xe7   :  { %564 = vrot.lane.b32.xlu1 %v6325_v6, %s6032_s27  ;;  %409 = vrot.lane.b32.xlu0 %v6323_v5, %s6032_s27 }
  0xeb   :  { %641 = vrot.lane.b32.xlu1 %v6321_v4, %s6032_s27  ;;  %487 = vrot.lane.b32.xlu0 %v6319_v3, %s6032_s27 }
 0x105   :  { %v6335_v7 = vpop.f32.mrf.mxu0 }
 0x106   :  { %795 = vrot.lane.b32.xlu1 %v6335_v7, %s6032_s27 }
 0x107   :  { %v6339_v8 = vpop.f32.mrf.mxu0  ;;  %v6341_v9 = vpop.f32.mrf.mxu1 }
 0x108   :  { %718 = vrot.lane.b32.xlu0 %v6339_v8, %s6032_s27 }
 0x109   :  { %v6347_v10 = vpop.f32.mrf.mxu1 }
 0x10a   :  { %949 = vrot.lane.b32.xlu1 %v6341_v9, %s6032_s27 }
 0x10c   :  { %872 = vrot.lane.b32.xlu0 %v6347_v10, %s6032_s27 }
 0x159   :  { %v410_v11 = vpop.permute.xlu0 %409  ;;  %v565_v12 = vpop.permute.xlu1 %564 }
 0x15a   :  { %5377 = vmatpush3.xpose.msk.msra.mxu0 %vm411_vm1, %v410_v11 }
 0x15b   :  { %5386 = vmatprep.subr.mxu0 %v6030_v2 }
 0x15d   :  { %5379 = vmatmul.mubr.msk.f32.vlgmr.msra.gmra.mxu0 %vm411_vm1, %v6323_v5  ;;  %v488_v13 = vpop.permute.xlu0 %487  ;;  %v642_v14 = vpop.permute.xlu1 %641 }
 0x15e   :  { %5382 = vmatpush3.xpose.msk.msra.mxu1 %vm411_vm1, %v488_v13  ;;  %5387 = vmatpush3.xpose.msk.msra.mxu0 %vm411_vm1, %v565_v12 }
 0x15f   :  { %5388 = vmatprep.mubr.msk.f32.mxu0 %vm6031_vm0, %v6030_v2  ;;  %5391 = vmatprep.subr.mxu1 %v6030_v2 }
 0x160   :  { %5396 = vmatprep.subr.mxu0 %v6030_v2 }
 0x161   :  { %5384 = vmatmul.mubr.msk.f32.vlgmr.msra.gmra.mxu1 %vm411_vm1, %v6319_v3  ;;  %5389 = vmatmul.mubr.msk.f32.vlgmr.msra.gmra.mxu0 %vm411_vm1, %v6325_v6 }
 0x162   :  { %5392 = vmatpush3.xpose.msk.msra.mxu1 %vm411_vm1, %v642_v14  ;;  %5393 = vmatprep.mubr.msk.f32.mxu1 %vm6031_vm0, %v6030_v2 }
 0x163   :  { %5401 = vmatprep.subr.mxu1 %v6030_v2  ;;  %5398 = vmatprep.mubr.msk.f32.mxu0 %vm6031_vm0, %v6030_v2 }
 0x165   :  { %5394 = vmatmul.mubr.msk.f32.vlgmr.msra.gmra.mxu1 %vm411_vm1, %v6321_v4 }
 0x166   :  { %5403 = vmatprep.mubr.msk.f32.mxu1 %vm6031_vm0, %v6030_v2 }
 0x178   :  { %v796_v15 = vpop.permute.xlu1 %795 }
 0x179   :  { %5402 = vmatpush3.xpose.msk.msra.mxu1 %vm411_vm1, %v796_v15 }
 0x17a   :  { %v719_v16 = vpop.permute.xlu0 %718  ;;  %5411 = vmatprep.subr.mxu1 %v6030_v2 }
 0x17b   :  { %5397 = vmatpush3.xpose.msk.msra.mxu0 %vm411_vm1, %v719_v16 }
 0x17c   :  { %5404 = vmatmul.mubr.msk.f32.vlgmr.msra.gmra.mxu1 %vm411_vm1, %v6335_v7  ;;  %v950_v17 = vpop.permute.xlu1 %949  ;;  %5406 = vmatprep.subr.mxu0 %v6030_v2 }
 0x17d   :  { %5412 = vmatpush3.xpose.msk.msra.mxu1 %vm411_vm1, %v950_v17  ;;  %5413 = vmatprep.mubr.msk.f32.mxu1 %vm6031_vm0, %v6030_v2 }
 0x17e   :  { %5399 = vmatmul.mubr.msk.f32.vlgmr.msra.gmra.mxu0 %vm411_vm1, %v6339_v8  ;;  %v873_v18 = vpop.permute.xlu0 %872  ;;  %5421 = vmatprep.subr.mxu1 %v6030_v2 }
 0x17f   :  { %5407 = vmatpush3.xpose.msk.msra.mxu0 %vm411_vm1, %v873_v18  ;;  %5408 = vmatprep.mubr.msk.f32.mxu0 %vm6031_vm0, %v6030_v2 }
 0x180   :  { %5414 = vmatmul.mubr.msk.f32.vlgmr.msra.gmra.mxu1 %vm411_vm1, %v6341_v9  ;;  %5416 = vmatprep.subr.mxu0 %v6030_v2 }
 0x181   :  { %5423 = vmatprep.mubr.msk.f32.mxu1 %vm6031_vm0, %v6030_v2 }
 0x182   :  { %5409 = vmatmul.mubr.msk.f32.vlgmr.msra.gmra.mxu0 %vm411_vm1, %v6347_v10 }
 0x183   :  { %5418 = vmatprep.mubr.msk.f32.mxu0 %vm6031_vm0, %v6030_v2 }
 0x21d   :  { %v482_v19 = vpop.f32.mrf.mxu0 }
 0x21e   :  { %v1026_v20 = vsel %vm1025_vm2, %v482_v19, -inf }
 0x21f   :  { %1027 = vmax.xlane.f32.xlu0 %v1026_v20  ;;  %v5380_v21 = vpop.f32.mrf.mxu0 }
 0x221   :  { %v559_v22 = vpop.f32.mrf.mxu1  ;;  %v636_v23 = vpop.f32.mrf.mxu0 }
 0x222   :  { %v1029_v24 = vsel %vm1025_vm2, %v559_v22, -inf  ;;  %v1032_v25 = vsel %vm1025_vm2, %v636_v23, -inf }
 0x223   :  { %v5385_v26 = vpop.f32.mrf.mxu1  ;;  %1030 = vmax.xlane.f32.xlu1 %v1029_v24  ;;  %1033 = vmax.xlane.f32.xlu0 %v1032_v25  ;;  %v5390_v27 = vpop.f32.mrf.mxu0 }
 0x225   :  { %v713_v28 = vpop.f32.mrf.mxu1 }
 0x226   :  { %v1035_v29 = vsel %vm1025_vm2, %v713_v28, -inf }
 0x227   :  { %v5395_v30 = vpop.f32.mrf.mxu1  ;;  %1036 = vmax.xlane.f32.xlu0 %v1035_v29 }
 0x23c   :  { %v867_v31 = vpop.f32.mrf.mxu1 }
 0x23d   :  { %v1041_v32 = vsel %vm1025_vm2, %v867_v31, -inf }
 0x23e   :  { %v5405_v34 = vpop.f32.mrf.mxu1  ;;  %1042 = vmax.xlane.f32.xlu0 %v1041_v32  ;;  %v790_v35 = vpop.f32.mrf.mxu0 }
 0x23f   :  { %v1038_v36 = vsel %vm1025_vm2, %v790_v35, -inf }
 0x240   :  { %v1021_v37 = vpop.f32.mrf.mxu1  ;;  %1039 = vmax.xlane.f32.xlu1 %v1038_v36  ;;  %v5400_v38 = vpop.f32.mrf.mxu0 }
 0x241   :  { %v1047_v39 = vsel %vm1025_vm2, %v1021_v37, -inf }
 0x242   :  { %v5415_v40 = vpop.f32.mrf.mxu1  ;;  %1048 = vmax.xlane.f32.xlu0 %v1047_v39  ;;  %v944_v41 = vpop.f32.mrf.mxu0 }
 0x243   :  { %v1044_v42 = vsel %vm1025_vm2, %v944_v41, -inf }
 0x244   :  { %1045 = vmax.xlane.f32.xlu1 %v1044_v42  ;;  %v5410_v43 = vpop.f32.mrf.mxu0 }
 0x255   :  { %1114 = vrot.lane.b32.xlu1 %v6323_v5, %s6033_s28 }
 0x258   :  { %1190 = vrot.lane.b32.xlu0 %v6319_v3, %s6033_s28 }
 0x259   :  { %1266 = vrot.lane.b32.xlu1 %v6325_v6, %s6033_s28 }
 0x25c   :  { %1418 = vrot.lane.b32.xlu0 %v6339_v8, %s6033_s28 }
 0x25d   :  { %1342 = vrot.lane.b32.xlu1 %v6321_v4, %s6033_s28 }
 0x261   :  { %1494 = vrot.lane.b32.xlu1 %v6335_v7, %s6033_s28 }
 0x2a8   :  { %v1028_v44 = vpop.xlane.xlu0 %1027 }
 0x2a9   :  { %v1050_v45 = vsub.f32 %v482_v19, %v1028_v44 }
 0x2ab   :  { %v1058_v46 = vmul.f32 1.442695, %v1050_v45 }
 0x2ac   :  { %v1031_v47 = vpop.xlane.xlu1 %1030  ;;  %v1034_v48 = vpop.xlane.xlu0 %1033 }
 0x2ad   :  { %5912 = vpow2.f32 %v1058_v46  ;;  %v1051_v49 = vsub.f32 %v559_v22, %v1031_v47  ;;  %v1052_v50 = vsub.f32 %v636_v23, %v1034_v48 }
 0x2af   :  { %v1060_v51 = vmul.f32 1.442695, %v1051_v49  ;;  %v1062_v52 = vmul.f32 1.442695, %v1052_v50  ;;  %v1725_v50 = vld [vmem:[%s7218_s2 + $0x18] sm:$0xff] }
 0x2b0   :  { %v1037_v53 = vpop.xlane.xlu0 %1036 }
 0x2b1   :  { %5914 = vpow2.f32 %v1060_v51  ;;  %v1053_v54 = vsub.f32 %v713_v28, %v1037_v53 }
 0x2b2   :  { %5916 = vpow2.f32 %v1062_v52 }
 0x2b3   :  { %v1064_v55 = vmul.f32 1.442695, %v1053_v54 }
 0x2b5   :  { %5918 = vpow2.f32 %v1064_v55  ;;  %v1724_v55 = vld [vmem:[%s7218_s2 + $0x10] sm:$0xff] }
 0x2ba   :  { %v5913_v56 = vpop.eup %5912 }
 0x2bb   :  { %v1074_v57 = vsel %vm1025_vm2, %v5913_v56, 0.0 }
 0x2bc   :  { %1075 = vadd.xlane.f32.xlu1 %v1074_v57  ;;  %v1729_v57 = vld [vmem:[%s7218_s2 + $0x38] sm:$0xff] }
 0x2be   :  { %v6420_v58 = vpop.eup %5914 }
 0x2bf   :  { %v6422_v59 = vpop.eup %5916  ;;  %v1077_v60 = vsel %vm1025_vm2, %v6420_v58, 0.0 }
 0x2c0   :  { %1078 = vadd.xlane.f32.xlu0 %v1077_v60  ;;  %v1080_v61 = vsel %vm1025_vm2, %v6422_v59, 0.0  ;;  %v1727_v60 = vld [vmem:[%s7218_s2 + $0x28] sm:$0xff] }
 0x2c1   :  { %1081 = vadd.xlane.f32.xlu1 %v1080_v61  ;;  %v1726_v61 = vld [vmem:[%s7218_s2 + $0x20] sm:$0xff] }
 0x2c2   :  { %v6428_v62 = vpop.eup %5918 }
 0x2c3   :  { %v1083_v63 = vsel %vm1025_vm2, %v6428_v62, 0.0 }
 0x2c4   :  { %1084 = vadd.xlane.f32.xlu0 %v1083_v63  ;;  %v1737_v63 = vld [vmem:[%s7218_s2 + $0x78] sm:$0xff] }
 0x2c7   :  { %v1043_v0 = vpop.xlane.xlu0 %1042 }
 0x2c8   :  { %v1055_v1 = vsub.f32 %v867_v31, %v1043_v0 }
 0x2c9   :  { %v1040_v3 = vpop.xlane.xlu1 %1039 }
 0x2ca   :  { %v1068_v4 = vmul.f32 1.442695, %v1055_v1  ;;  %v1054_v5 = vsub.f32 %v790_v35, %v1040_v3 }
 0x2cb   :  { %v1049_v6 = vpop.xlane.xlu0 %1048 }
 0x2cc   :  { %5920 = vpow2.f32 %v1068_v4  ;;  %v1066_v7 = vmul.f32 1.442695, %v1054_v5  ;;  %v1057_v8 = vsub.f32 %v1021_v37, %v1049_v6  ;;  %v1732_v4 = vld [vmem:[%s7218_s2 + $0x50] sm:$0xff] }
 0x2cd   :  { %v1046_v11 = vpop.xlane.xlu1 %1045 }
 0x2ce   :  { %5922 = vpow2.f32 %v1066_v7  ;;  %v1072_v12 = vmul.f32 1.442695, %v1057_v8  ;;  %v1056_v13 = vsub.f32 %v944_v41, %v1046_v11  ;;  %v1731_v7 = vld [vmem:[%s7218_s2 + $0x48] sm:$0xff] }
 0x2cf   :  { %v1191_v14 = vpop.permute.xlu0 %1190 }
 0x2d0   :  { %5924 = vpow2.f32 %v1072_v12  ;;  %v1070_v15 = vmul.f32 1.442695, %v1056_v13  ;;  %5422 = vmatpush3.msra.mxu1 %v1191_v14  ;;  %v1730_v12 = vld [vmem:[%s7218_s2 + $0x40] sm:$0xff]  ;;  %v1736_v13 = vld [vmem:[%s7218_s2 + $0x70] sm:$0xff] }
 0x2d1   :  { %v1115_v16 = vpop.permute.xlu1 %1114  ;;  %5431 = vmatprep.subr.mxu1 %v6030_v2 }
 0x2d2   :  { %5926 = vpow2.f32 %v1070_v15  ;;  %5417 = vmatpush3.msra.mxu0 %v1115_v16  ;;  %v1735_v15 = vld [vmem:[%s7218_s2 + $0x68] sm:$0xff]  ;;  %v1734_v16 = vld [vmem:[%s7218_s2 + $0x60] sm:$0xff] }
 0x2d3   :  { %5426 = vmatprep.subr.mxu0 %v6030_v2  ;;  %v1419_v28 = vpop.permute.xlu0 %1418 }
 0x2d5   :  { %v1267_v25 = vpop.permute.xlu1 %1266 }
 0x2d9   :  { %v5921_v17 = vpop.eup %5920  ;;  %v1343_v26 = vpop.permute.xlu1 %1342 }
 0x2da   :  { %v1089_v18 = vsel %vm1025_vm2, %v5921_v17, 0.0 }
 0x2db   :  { %v5923_v19 = vpop.eup %5922  ;;  %1090 = vadd.xlane.f32.xlu0 %v1089_v18 }
 0x2dc   :  { %v1086_v20 = vsel %vm1025_vm2, %v5923_v19, 0.0 }
 0x2dd   :  { %v6436_v21 = vpop.eup %5924  ;;  %1087 = vadd.xlane.f32.xlu1 %v1086_v20  ;;  %v1495_v27 = vpop.permute.xlu1 %1494 }
 0x2de   :  { %v1095_v22 = vsel %vm1025_vm2, %v6436_v21, 0.0 }
 0x2df   :  { %v6440_v23 = vpop.eup %5926  ;;  %1096 = vadd.xlane.f32.xlu0 %v1095_v22 }
 0x2e0   :  { %v1092_v24 = vsel %vm1025_vm2, %v6440_v23, 0.0 }
 0x2e1   :  { %1093 = vadd.xlane.f32.xlu1 %v1092_v24 }
 0x2f2   :  { %1646 = vrot.lane.b32.xlu1 %v6341_v9, %s6033_s28 }
 0x2f5   :  { %1570 = vrot.lane.b32.xlu0 %v6347_v10, %s6033_s28 }
 0x345   :  { %v1076_v29 = vpop.xlane.xlu1 %1075 }
 0x346   :  { %5928 = vrcp.f32 %v1076_v29  ;;  %v2121_v29 = vld [vmem:[%s7221_s5 + $0x58] sm:$0xff] }
 0x349   :  { %v1079_v30 = vpop.xlane.xlu0 %1078 }
 0x34a   :  { %5930 = vrcp.f32 %v1079_v30  ;;  %v1082_v31 = vpop.xlane.xlu1 %1081  ;;  %v2120_v30 = vld [vmem:[%s7221_s5 + $0x50] sm:$0xff] }
 0x34b   :  { %5932 = vrcp.f32 %v1082_v31  ;;  %v2119_v31 = vld [vmem:[%s7221_s5 + $0x48] sm:$0xff] }
 0x34d   :  { %v1085_v32 = vpop.xlane.xlu0 %1084 }
 0x34e   :  { %5934 = vrcp.f32 %v1085_v32  ;;  %v2118_v32 = vld [vmem:[%s7221_s5 + $0x40] sm:$0xff] }
 0x353   :  { %v5929_v34 = vpop.eup %5928 }
 0x354   :  { %v1106_v35 = vmul.f32 %v5929_v34, %v5913_v56  ;;  %v1723_v56 = vld [vmem:[%s7218_s2 + $0x8] sm:$0xff]  ;;  %v2117_v34 = vld [vmem:[%s7221_s5 + $0x38] sm:$0xff] }
 0x356   :  { %5419 = vmatmul.mubr.msk.f32.vlgmr.msra.gmra.mxu0 %vm1025_vm2, %v1106_v35  ;;  %v2116_v35 = vld [vmem:[%s7221_s5 + $0x30] sm:$0xff] }
 0x357   :  { %v5931_v9 = vpop.eup %5930  ;;  %5427 = vmatpush3.msra.mxu0 %v1267_v25  ;;  %5428 = vmatprep.mubr.msk.f32.mxu0 %vm6031_vm0, %v6030_v2  ;;  %v2125_v25 = vld [vmem:[%s7221_s5 + $0x78] sm:$0xff] }
 0x358   :  { %v5933_v10 = vpop.eup %5932  ;;  %5436 = vmatprep.subr.mxu0 %v6030_v2  ;;  %v1107_v36 = vmul.f32 %v5931_v9, %v6420_v58  ;;  %v1722_v58 = vld [vmem:[%s7218_s2] sm:$0xff]  ;;  %v2115_v9 = vld [vmem:[%s7221_s5 + $0x28] sm:$0xff] }
 0x359   :  { %v1108_v37 = vmul.f32 %v5933_v10, %v6422_v59  ;;  %v1728_v59 = vld [vmem:[%s7218_s2 + $0x30] sm:$0xff]  ;;  %v2114_v10 = vld [vmem:[%s7221_s5 + $0x20] sm:$0xff] }
 0x35a   :  { %5424 = vmatmul.mubr.msk.f32.vlgmr.msra.gmra.mxu1 %vm1025_vm2, %v1107_v36  ;;  %v2113_v36 = vld [vmem:[%s7221_s5 + $0x18] sm:$0xff] }
 0x35b   :  { %v5935_v38 = vpop.eup %5934  ;;  %5429 = vmatmul.mubr.msk.f32.vlgmr.msra.gmra.mxu0 %vm1025_vm2, %v1108_v37  ;;  %5432 = vmatpush3.msra.mxu1 %v1343_v26  ;;  %v2124_v26 = vld [vmem:[%s7221_s5 + $0x70] sm:$0xff] }
 0x35c   :  { %5437 = vmatpush3.msra.mxu0 %v1419_v28  ;;  %5433 = vmatprep.mubr.msk.f32.mxu1 %vm6031_vm0, %v6030_v2  ;;  %v1109_v39 = vmul.f32 %v5935_v38, %v6428_v62  ;;  %v1733_v62 = vld [vmem:[%s7218_s2 + $0x58] sm:$0xff]  ;;  %v2122_v28 = vld [vmem:[%s7221_s5 + $0x60] sm:$0xff]  ;;  %v2112_v37 = vld [vmem:[%s7221_s5 + $0x10] sm:$0xff] }
 0x35d   :  { %5441 = vmatprep.subr.mxu1 %v6030_v2  ;;  %5438 = vmatprep.mubr.msk.f32.mxu0 %vm6031_vm0, %v6030_v2  ;;  %v2111_v38 = vld [vmem:[%s7221_s5 + $0x8] sm:$0xff] }
 0x35e   :  { %5434 = vmatmul.mubr.msk.f32.vlgmr.msra.gmra.mxu1 %vm1025_vm2, %v1109_v39  ;;  %5446 = vmatprep.subr.mxu0 %v6030_v2  ;;  %v2110_v39 = vld [vmem:[%s7221_s5] sm:$0xff] }
 0x35f   :  { %5442 = vmatpush3.msra.mxu1 %v1495_v27  ;;  %5443 = vmatprep.mubr.msk.f32.mxu1 %vm6031_vm0, %v6030_v2  ;;  %v2123_v27 = vld [vmem:[%s7221_s5 + $0x68] sm:$0xff] }
 0x360   :  { %5451 = vmatprep.subr.mxu1 %v6030_v2 }
 0x364   :  { %v1091_v40 = vpop.xlane.xlu0 %1090 }
 0x365   :  { %5936 = vrcp.f32 %v1091_v40  ;;  %v2225_v40 = vld [vmem:[%s7223_s7 + $0x78] sm:$0xff] }
 0x366   :  { %v1088_v41 = vpop.xlane.xlu1 %1087 }
 0x367   :  { %5938 = vrcp.f32 %v1088_v41  ;;  %v2224_v41 = vld [vmem:[%s7223_s7 + $0x70] sm:$0xff] }
 0x368   :  { %v1097_v42 = vpop.xlane.xlu0 %1096 }
 0x369   :  { %5940 = vrcp.f32 %v1097_v42  ;;  %v2223_v42 = vld [vmem:[%s7223_s7 + $0x68] sm:$0xff] }
 0x36a   :  { %v1094_v43 = vpop.xlane.xlu1 %1093 }
 0x36b   :  { %5942 = vrcp.f32 %v1094_v43  ;;  %v2222_v43 = vld [vmem:[%s7223_s7 + $0x60] sm:$0xff] }
 0x36c   :  { %v1571_v51 = vpop.permute.xlu0 %1570 }
 0x36e   :  { %v1647_v47 = vpop.permute.xlu1 %1646 }
 0x372   :  { %v5937_v44 = vpop.eup %5936 }
 0x373   :  { %v1111_v45 = vmul.f32 %v5937_v44, %v5921_v17  ;;  %v2221_v44 = vld [vmem:[%s7223_s7 + $0x58] sm:$0xff] }
 0x374   :  { %v5939_v46 = vpop.eup %5938 }
 0x375   :  { %5444 = vmatmul.mubr.msk.f32.vlgmr.msra.gmra.mxu1 %vm1025_vm2, %v1111_v45  ;;  %v1110_v48 = vmul.f32 %v5939_v46, %v5923_v19  ;;  %v2220_v45 = vld [vmem:[%s7223_s7 + $0x50] sm:$0xff]  ;;  %v2219_v46 = vld [vmem:[%s7223_s7 + $0x48] sm:$0xff] }
 0x376   :  { %v5941_v49 = vpop.eup %5940  ;;  %5452 = vmatpush3.msra.mxu1 %v1647_v47  ;;  %5453 = vmatprep.mubr.msk.f32.mxu1 %vm6031_vm0, %v6030_v2  ;;  %v2218_v47 = vld [vmem:[%s7223_s7 + $0x40] sm:$0xff] }
 0x377   :  { %5439 = vmatmul.mubr.msk.f32.vlgmr.msra.gmra.mxu0 %vm1025_vm2, %v1110_v48  ;;  %v1113_v52 = vmul.f32 %v5941_v49, %v6436_v21  ;;  %5467 = vmatprep.subr.mxu1 %v1729_v57  ;;  %v2217_v48 = vld [vmem:[%s7223_s7 + $0x38] sm:$0xff]  ;;  %v2216_v49 = vld [vmem:[%s7223_s7 + $0x30] sm:$0xff] }
 0x378   :  { %v5943_v53 = vpop.eup %5942  ;;  %5447 = vmatpush3.msra.mxu0 %v1571_v51  ;;  %5448 = vmatprep.mubr.msk.f32.mxu0 %vm6031_vm0, %v6030_v2  ;;  %v2214_v51 = vld [vmem:[%s7223_s7 + $0x20] sm:$0xff] }
 0x379   :  { %5454 = vmatmul.mubr.msk.f32.vlgmr.msra.gmra.mxu1 %vm1025_vm2, %v1113_v52  ;;  %v1112_v54 = vmul.f32 %v5943_v53, %v6440_v23  ;;  %5456 = vmatprep.subr.mxu0 %v1725_v50 }
 0x37a   :  { %5468 = vmatpush3.msra.mxu1 %v1729_v57 }
 0x37b   :  { %5449 = vmatmul.mubr.msk.f32.vlgmr.msra.gmra.mxu0 %vm1025_vm2, %v1112_v54  ;;  %5469 = vmatprep.subr.mxu1 %v1728_v59 }
 0x37c   :  { %5457 = vmatpush3.msra.mxu0 %v1725_v50  ;;  %5470 = vmatpush3.msra.mxu1 %v1728_v59  ;;  %v2215_v50 = vld [vmem:[%s7223_s7 + $0x28] sm:$0xff] }
 0x37d   :  { %5458 = vmatprep.subr.mxu0 %v1724_v55  ;;  %5471 = vmatprep.subr.mxu1 %v1727_v60 }
 0x37e   :  { %5459 = vmatpush3.msra.mxu0 %v1724_v55  ;;  %5472 = vmatpush3.msra.mxu1 %v1727_v60 }
 0x37f   :  { %5460 = vmatprep.subr.mxu0 %v1723_v56  ;;  %5473 = vmatprep.subr.mxu1 %v1726_v61 }
 0x380   :  { %5461 = vmatpush3.msra.mxu0 %v1723_v56  ;;  %5474 = vmatpush3.msra.mxu1 %v1726_v61 }
 0x381   :  { %5462 = vmatprep.subr.mxu0 %v1722_v58  ;;  %5489 = vmatprep.subr.mxu1 %v1737_v63 }
 0x382   :  { %5463 = vmatpush3.msra.mxu0 %v1722_v58 }
 0x383   :  { %5478 = vmatprep.subr.mxu0 %v1733_v62 }
 0x416   :  { %v1186_v0 = vpop.f32.mrf.mxu0 }
 0x417   :  { %5464 = vmatprep.mubr.msk.f32.mxu0 %vm411_vm1, %v1186_v0 }
 0x418   :  { %v5420_v1 = vpop.f32.mrf.mxu0 }
 0x41a   :  { %v1262_v3 = vpop.f32.mrf.mxu1 }
 0x41b   :  { %v1338_v5 = vpop.f32.mrf.mxu0  ;;  %5465 = vmatmul.mubr.msk.f32.vlgmr.msra.gmra.mxu0 %vm411_vm1, %v1262_v3 }
 0x41c   :  { %5475 = vmatprep.mubr.msk.f32.mxu1 %vm411_vm1, %v1338_v5  ;;  %v5425_v6 = vpop.f32.mrf.mxu1  ;;  %5479 = vmatpush3.msra.mxu0 %v1733_v62 }
 0x41d   :  { %v5430_v8 = vpop.f32.mrf.mxu0  ;;  %5480 = vmatprep.subr.mxu0 %v1732_v4 }
 0x41e   :  { %v1414_v11 = vpop.f32.mrf.mxu1  ;;  %5481 = vmatpush3.msra.mxu0 %v1732_v4  ;;  %v6621_v4 = vld [vmem:[%s7216_s0] sm:$0xff] }
 0x41f   :  { %5476 = vmatmul.mubr.msk.f32.vlgmr.msra.gmra.mxu1 %vm411_vm1, %v1414_v11  ;;  %5482 = vmatprep.subr.mxu0 %v1731_v7 }
 0x420   :  { %v5435_v14 = vpop.f32.mrf.mxu1  ;;  %5483 = vmatpush3.msra.mxu0 %v1731_v7  ;;  %5490 = vmatpush3.msra.mxu1 %v1737_v63 }
 0x421   :  { %5484 = vmatprep.subr.mxu0 %v1730_v12  ;;  %5491 = vmatprep.subr.mxu1 %v1736_v13 }
 0x422   :  { %5485 = vmatpush3.msra.mxu0 %v1730_v12  ;;  %5492 = vmatpush3.msra.mxu1 %v1736_v13 }
 0x423   :  { %5493 = vmatprep.subr.mxu1 %v1735_v15  ;;  %5500 = vmatprep.subr.mxu0 %v2125_v25 }
 0x424   :  { %5494 = vmatpush3.msra.mxu1 %v1735_v15 }
 0x425   :  { %5495 = vmatprep.subr.mxu1 %v1734_v16 }
 0x426   :  { %5496 = vmatpush3.msra.mxu1 %v1734_v16 }
 0x427   :  { %5535 = vmatprep.subr.mxu1 %v2225_v40 }
 0x435   :  { %v1566_v17 = vpop.f32.mrf.mxu1 }
 0x437   :  { %v1490_v18 = vpop.f32.mrf.mxu0  ;;  %v5445_v19 = vpop.f32.mrf.mxu1 }
 0x438   :  { %5486 = vmatprep.mubr.msk.f32.mxu0 %vm411_vm1, %v1490_v18 }
 0x439   :  { %v5440_v20 = vpop.f32.mrf.mxu0  ;;  %v1718_v21 = vpop.f32.mrf.mxu1  ;;  %5487 = vmatmul.mubr.msk.f32.vlgmr.msra.gmra.mxu0 %vm411_vm1, %v1566_v17 }
 0x43a   :  { %5501 = vmatpush3.msra.mxu0 %v2125_v25 }
 0x43b   :  { %v1642_v22 = vpop.f32.mrf.mxu0  ;;  %v5455_v23 = vpop.f32.mrf.mxu1  ;;  %5502 = vmatprep.subr.mxu0 %v2124_v26 }
 0x43c   :  { %5497 = vmatprep.mubr.msk.f32.mxu1 %vm411_vm1, %v1642_v22  ;;  %5503 = vmatpush3.msra.mxu0 %v2124_v26 }
 0x43d   :  { %v5450_v24 = vpop.f32.mrf.mxu0  ;;  %5498 = vmatmul.mubr.msk.f32.vlgmr.msra.gmra.mxu1 %vm411_vm1, %v1718_v21  ;;  %5504 = vmatprep.subr.mxu0 %v2123_v27 }
 0x43e   :  { %5505 = vmatpush3.msra.mxu0 %v2123_v27  ;;  %5536 = vmatpush3.msra.mxu1 %v2225_v40  ;;  %v2212_v40 = vld [vmem:[%s7223_s7 + $0x10] sm:$0xff] }
 0x43f   :  { %5506 = vmatprep.subr.mxu0 %v2122_v28  ;;  %5537 = vmatprep.subr.mxu1 %v2224_v41 }
 0x440   :  { %5507 = vmatpush3.msra.mxu0 %v2122_v28  ;;  %5538 = vmatpush3.msra.mxu1 %v2224_v41  ;;  %v2095_v28 = vlaneseq  ;;  %v2211_v41 = vld [vmem:[%s7223_s7 + $0x8] sm:$0xff] }
 0x441   :  { %5508 = vmatprep.subr.mxu0 %v2121_v29  ;;  %5539 = vmatprep.subr.mxu1 %v2223_v42 }
 0x442   :  { %5509 = vmatpush3.msra.mxu0 %v2121_v29  ;;  %5540 = vmatpush3.msra.mxu1 %v2223_v42  ;;  %v2096_v29 = vshrl.u32 %v2095_v28, 7  ;;  %v2210_v42 = vld [vmem:[%s7223_s7] sm:$0xff] }
 0x443   :  { %5510 = vmatprep.subr.mxu0 %v2120_v30  ;;  %5541 = vmatprep.subr.mxu1 %v2222_v43 }
 0x444   :  { %5511 = vmatpush3.msra.mxu0 %v2120_v30  ;;  %5542 = vmatpush3.msra.mxu1 %v2222_v43  ;;  %v2093_v30 = vld [vmem:[%s7219_s3] sm:$0x1] }
 0x445   :  { %5512 = vmatprep.subr.mxu0 %v2119_v31  ;;  %5543 = vmatprep.subr.mxu1 %v2221_v44  ;;  %v4751_v43 = vld [vmem:[%s7222_s6] ss:$0 sm:$0xff] }
 0x446   :  { %5513 = vmatpush3.msra.mxu0 %v2119_v31  ;;  %5544 = vmatpush3.msra.mxu1 %v2221_v44  ;;  %v6627_v31 = vsub.s32 0, %v2096_v29 }
 0x447   :  { %5514 = vmatprep.subr.mxu0 %v2118_v32  ;;  %5545 = vmatprep.subr.mxu1 %v2220_v45 }
 0x448   :  { %5515 = vmatpush3.msra.mxu0 %v2118_v32  ;;  %5546 = vmatpush3.msra.mxu1 %v2220_v45 }
 0x449   :  { %5516 = vmatprep.subr.mxu0 %v2117_v34  ;;  %5547 = vmatprep.subr.mxu1 %v2219_v46 }
 0x44a   :  { %5517 = vmatpush3.msra.mxu0 %v2117_v34  ;;  %5548 = vmatpush3.msra.mxu1 %v2219_v46 }
 0x44b   :  { %5518 = vmatprep.subr.mxu0 %v2116_v35  ;;  %5549 = vmatprep.subr.mxu1 %v2218_v47 }
 0x44c   :  { %5519 = vmatpush3.msra.mxu0 %v2116_v35  ;;  %5550 = vmatpush3.msra.mxu1 %v2218_v47 }
 0x44d   :  { %5520 = vmatprep.subr.mxu0 %v2115_v9  ;;  %5551 = vmatprep.subr.mxu1 %v2217_v48 }
 0x44e   :  { %5521 = vmatpush3.msra.mxu0 %v2115_v9  ;;  %5552 = vmatpush3.msra.mxu1 %v2217_v48  ;;  %v4750_v9 = vld [vmem:[%s7220_s4] ss:$0 sm:$0xff] }
 0x44f   :  { %5522 = vmatprep.subr.mxu0 %v2114_v10  ;;  %5553 = vmatprep.subr.mxu1 %v2216_v49 }
 0x450   :  { %5523 = vmatpush3.msra.mxu0 %v2114_v10  ;;  %5554 = vmatpush3.msra.mxu1 %v2216_v49 }
 0x451   :  { %5524 = vmatprep.subr.mxu0 %v2113_v36  ;;  %5555 = vmatprep.subr.mxu1 %v2215_v50 }
 0x452   :  { %5525 = vmatpush3.msra.mxu0 %v2113_v36  ;;  %5556 = vmatpush3.msra.mxu1 %v2215_v50  ;;  %v4769_v50 = vld [vmem:[%s7217_s1 + $0x278] sm:$0xff] }
 0x453   :  { %5526 = vmatprep.subr.mxu0 %v2112_v37  ;;  %5557 = vmatprep.subr.mxu1 %v2214_v51 }
 0x454   :  { %5527 = vmatpush3.msra.mxu0 %v2112_v37  ;;  %5558 = vmatpush3.msra.mxu1 %v2214_v51  ;;  %v4785_v51 = vld [vmem:[%s7217_s1 + $0x2f8] sm:$0xff] }
 0x455   :  { %5528 = vmatprep.subr.mxu0 %v2111_v38 }
 0x456   :  { %5529 = vmatpush3.msra.mxu0 %v2111_v38 }
 0x457   :  { %5530 = vmatprep.subr.mxu0 %v2110_v39 }
 0x458   :  { %5531 = vmatpush3.msra.mxu0 %v2110_v39  ;;  %v2213_v39 = vld [vmem:[%s7223_s7 + $0x18] sm:$0xff] }
 0x459   :  { %5559 = vmatprep.subr.mxu1 %v2213_v39  ;;  %5570 = vmatprep.subr.mxu0 %v4769_v50 }
 0x45a   :  { %5560 = vmatpush3.msra.mxu1 %v2213_v39 }
 0x45b   :  { %5561 = vmatprep.subr.mxu1 %v2212_v40 }
 0x45c   :  { %5562 = vmatpush3.msra.mxu1 %v2212_v40 }
 0x45d   :  { %5563 = vmatprep.subr.mxu1 %v2211_v41 }
 0x45e   :  { %5564 = vmatpush3.msra.mxu1 %v2211_v41 }
 0x45f   :  { %5565 = vmatprep.subr.mxu1 %v2210_v42 }
 0x460   :  { %5566 = vmatpush3.msra.mxu1 %v2210_v42 }
 0x461   :  { %5605 = vmatprep.subr.mxu1 %v4785_v51 }
 0x4db   :  { %v5466_v52 = vpop.f32.mrf.mxu0 }
 0x4dd   :  { %v1810_v54 = vpop.f32.mrf.mxu0 }
 0x4df   :  { %v5477_v53 = vpop.f32.mrf.mxu1 }
 0x4e0   :  { %v2065_v57 = vadd.f32 %v5477_v53, %v5466_v52  ;;  %v4768_v52 = vld [vmem:[%s7217_s1 + $0x270] sm:$0xff] }
 0x4e1   :  { %v1891_v55 = vpop.f32.mrf.mxu1  ;;  %v4784_v53 = vld [vmem:[%s7217_s1 + $0x2f0] sm:$0xff] }
 0x4e2   :  { %v2062_v59 = vadd.f32 %v1891_v55, %v1810_v54  ;;  %v4767_v54 = vld [vmem:[%s7217_s1 + $0x268] sm:$0xff] }
 0x4e3   :  { %v4783_v55 = vld [vmem:[%s7217_s1 + $0x2e8] sm:$0xff] }
 0x4f9   :  { %v5488_v56 = vpop.f32.mrf.mxu0 }
 0x4fa   :  { %v2066_v60 = vadd.f32 %v5488_v56, %v2065_v57  ;;  %v4766_v56 = vld [vmem:[%s7217_s1 + $0x260] sm:$0xff] }
 0x4fb   :  { %v1972_v58 = vpop.f32.mrf.mxu0  ;;  %v4782_v57 = vld [vmem:[%s7217_s1 + $0x2e0] sm:$0xff] }
 0x4fc   :  { %v2063_v62 = vadd.f32 %v2062_v59, %v1972_v58  ;;  %v4765_v58 = vld [vmem:[%s7217_s1 + $0x258] sm:$0xff] }
 0x4fd   :  { %v5499_v61 = vpop.f32.mrf.mxu1  ;;  %v4781_v59 = vld [vmem:[%s7217_s1 + $0x2d8] sm:$0xff] }
 0x4fe   :  { %v2067_v63 = vadd.f32 %v5499_v61, %v2066_v60  ;;  %v4764_v60 = vld [vmem:[%s7217_s1 + $0x250] sm:$0xff] }
 0x4ff   :  { %v2053_v0 = vpop.f32.mrf.mxu1  ;;  %v4780_v61 = vld [vmem:[%s7217_s1 + $0x2d0] sm:$0xff] }
 0x500   :  { %v2064_v1 = vadd.f32 %v2063_v62, %v2053_v0  ;;  %v2069_v3 = vadd.f32 %v2067_v63, %v6207_v33  ;;  %v4763_v62 = vld [vmem:[%s7217_s1 + $0x248] sm:$0xff]  ;;  %v4762_v0 = vld [vmem:[%s7217_s1 + $0x240] sm:$0xff] }
 0x501   :  { %v4779_v63 = vld [vmem:[%s7217_s1 + $0x2c8] sm:$0xff] }
 0x502   :  { %v2068_v5 = vadd.f32 %v6621_v4, %v2064_v1  ;;  %v4778_v1 = vld [vmem:[%s7217_s1 + $0x2c0] sm:$0xff] }
 0x504   :  { %v2070_v6 = vadd.f32 %v2069_v3, %v2068_v5 }
 0x506   :  { %v2071_v7 = vrot.slane %v2070_v6, 4 }
 0x508   :  { %v2072_v8 = vadd.f32 %v2071_v7, %v2070_v6  ;;  %v4760_v6 = vld [vmem:[%s7217_s1 + $0x230] sm:$0xff] }
 0x509   :  { %v4776_v7 = vld [vmem:[%s7217_s1 + $0x2b0] sm:$0xff] }
 0x50a   :  { %v2073_v11 = vrot.slane %v2072_v8, 2 }
 0x50c   :  { %v2074_v12 = vadd.f32 %v2073_v11, %v2072_v8  ;;  %v4759_v8 = vld [vmem:[%s7217_s1 + $0x228] sm:$0xff] }
 0x50d   :  { %v4775_v11 = vld [vmem:[%s7217_s1 + $0x2a8] sm:$0xff] }
 0x50e   :  { %v2075_v13 = vrot.slane %v2074_v12, 1 }
 0x510   :  { %v2076_v14 = vadd.f32 %v2075_v13, %v2074_v12  ;;  %v4758_v12 = vld [vmem:[%s7217_s1 + $0x220] sm:$0xff] }
 0x511   :  { %v4774_v13 = vld [vmem:[%s7217_s1 + $0x2a0] sm:$0xff] }
 0x512   :  { %v2078_v15 = vmul.f32 0.0625, %v2076_v14  ;;  %v4757_v14 = vld [vmem:[%s7217_s1 + $0x218] sm:$0xff] }
 0x514   :  { %v2079_v16 = vsub.f32 %v2068_v5, %v2078_v15  ;;  %v2080_v17 = vsub.f32 %v2069_v3, %v2078_v15  ;;  %v4761_v3 = vld [vmem:[%s7217_s1 + $0x238] sm:$0xff] }
 0x515   :  { %v4777_v5 = vld [vmem:[%s7217_s1 + $0x2b8] sm:$0xff] }
 0x516   :  { %v2081_v18 = vmul.f32 %v2079_v16, %v2079_v16  ;;  %v2082_v19 = vmul.f32 %v2080_v17, %v2080_v17  ;;  %v4773_v15 = vld [vmem:[%s7217_s1 + $0x298] sm:$0xff] }
 0x518   :  { %v2083_v33 = vadd.f32 %v2082_v19, %v2081_v18  ;;  %v4755_v18 = vld [vmem:[%s7217_s1 + $0x208] sm:$0xff] }
 0x519   :  { %v4771_v19 = vld [vmem:[%s7217_s1 + $0x288] sm:$0xff] }
 0x51a   :  { %v2084_v20 = vrot.slane %v2083_v33, 4 }
 0x51c   :  { %v2085_v21 = vadd.f32 %v2084_v20, %v2083_v33  ;;  %v4754_v33 = vld [vmem:[%s7217_s1 + $0x200] sm:$0xff] }
 0x51d   :  { %v4770_v20 = vld [vmem:[%s7217_s1 + $0x280] sm:$0xff] }
 0x51e   :  { %v2086_v22 = vrot.slane %v2085_v21, 2 }
 0x520   :  { %v2087_v23 = vadd.f32 %v2086_v22, %v2085_v21  ;;  %v4801_v21 = vld [vmem:[%s7217_s1 + $0x378] sm:$0xff] }
 0x521   :  { %v4817_v22 = vld [vmem:[%s7217_s1 + $0x3f8] sm:$0xff] }
 0x522   :  { %v2088_v24 = vrot.slane %v2087_v23, 1 }
 0x524   :  { %v2089_v25 = vadd.f32 %v2088_v24, %v2087_v23  ;;  %v4752_v23 = vld [vmem:[%s7224_s8] ss:$0 sm:$0xff] }
 0x526   :  { %v2090_v26 = vmul.f32 0.0625, %v2089_v25 }
 0x528   :  { %v2091_v27 = vadd.f32 1e-05, %v2090_v26 }
 0x52a   :  { %5944 = vrsqrt.f32 %v2091_v27 }
 0x537   :  { %v5945_v32 = vpop.eup %5944 }
 0x538   :  { %v2094_v34 = vmul.f32 %v5945_v32, %v2093_v30 }
 0x53a   :  { %v2098_v35 = vrot.slane %v2094_v34, %v6627_v31 }
 0x53c   :  { %v2099_v10 = vmul.f32 %v2098_v35, %v2079_v16  ;;  %v2100_v36 = vmul.f32 %v2098_v35, %v2080_v17  ;;  %v4756_v16 = vld [vmem:[%s7217_s1 + $0x210] sm:$0xff] }
 0x53d   :  { %v4772_v17 = vld [vmem:[%s7217_s1 + $0x290] sm:$0xff] }
 0x53e   :  { %v6633_v37 = vadd.f32 %v4750_v9, %v2099_v10  ;;  %v6635_v38 = vadd.f32 %v4750_v9, %v2100_v36 }
 0x540   :  { %5532 = vmatprep.mubr.f32.mxu0 %v6633_v37 }
 0x541   :  { %5533 = vmatmul.mubr.f32.vlgmr.msra.gmra.mxu0 %v6635_v38 }
 0x542   :  { %5571 = vmatpush3.msra.mxu0 %v4769_v50 }
 0x543   :  { %5572 = vmatprep.subr.mxu0 %v4768_v52 }
 0x544   :  { %5573 = vmatpush3.msra.mxu0 %v4768_v52 }
 0x545   :  { %5574 = vmatprep.subr.mxu0 %v4767_v54 }
 0x546   :  { %5575 = vmatpush3.msra.mxu0 %v4767_v54 }
 0x547   :  { %5576 = vmatprep.subr.mxu0 %v4766_v56 }
 0x548   :  { %5577 = vmatpush3.msra.mxu0 %v4766_v56 }
 0x549   :  { %5578 = vmatprep.subr.mxu0 %v4765_v58 }
 0x54a   :  { %5579 = vmatpush3.msra.mxu0 %v4765_v58 }
 0x54b   :  { %5580 = vmatprep.subr.mxu0 %v4764_v60 }
 0x54c   :  { %5581 = vmatpush3.msra.mxu0 %v4764_v60 }
 0x54d   :  { %5582 = vmatprep.subr.mxu0 %v4763_v62 }
 0x54e   :  { %5583 = vmatpush3.msra.mxu0 %v4763_v62 }
 0x54f   :  { %5584 = vmatprep.subr.mxu0 %v4762_v0 }
 0x550   :  { %5585 = vmatpush3.msra.mxu0 %v4762_v0  ;;  %v4799_v0 = vld [vmem:[%s7217_s1 + $0x368] sm:$0xff] }
 0x551   :  { %5586 = vmatprep.subr.mxu0 %v4761_v3 }
 0x552   :  { %5587 = vmatpush3.msra.mxu0 %v4761_v3  ;;  %v4798_v3 = vld [vmem:[%s7217_s1 + $0x360] sm:$0xff] }
 0x553   :  { %5588 = vmatprep.subr.mxu0 %v4760_v6 }
 0x554   :  { %5589 = vmatpush3.msra.mxu0 %v4760_v6  ;;  %v4797_v6 = vld [vmem:[%s7217_s1 + $0x358] sm:$0xff] }
 0x555   :  { %5590 = vmatprep.subr.mxu0 %v4759_v8 }
 0x556   :  { %5591 = vmatpush3.msra.mxu0 %v4759_v8  ;;  %v4796_v8 = vld [vmem:[%s7217_s1 + $0x350] sm:$0xff] }
 0x557   :  { %5592 = vmatprep.subr.mxu0 %v4758_v12 }
 0x558   :  { %5593 = vmatpush3.msra.mxu0 %v4758_v12  ;;  %v4795_v12 = vld [vmem:[%s7217_s1 + $0x348] sm:$0xff] }
 0x559   :  { %5594 = vmatprep.subr.mxu0 %v4757_v14 }
 0x55a   :  { %5595 = vmatpush3.msra.mxu0 %v4757_v14  ;;  %v4794_v14 = vld [vmem:[%s7217_s1 + $0x340] sm:$0xff] }
 0x55b   :  { %5596 = vmatprep.subr.mxu0 %v4756_v16 }
 0x55c   :  { %5597 = vmatpush3.msra.mxu0 %v4756_v16  ;;  %v4793_v16 = vld [vmem:[%s7217_s1 + $0x338] sm:$0xff] }
 0x55d   :  { %5598 = vmatprep.subr.mxu0 %v4755_v18 }
 0x55e   :  { %5599 = vmatpush3.msra.mxu0 %v4755_v18  ;;  %v4792_v18 = vld [vmem:[%s7217_s1 + $0x330] sm:$0xff] }
 0x55f   :  { %5600 = vmatprep.subr.mxu0 %v4754_v33 }
 0x560   :  { %5601 = vmatpush3.msra.mxu0 %v4754_v33  ;;  %v4791_v33 = vld [vmem:[%s7217_s1 + $0x328] sm:$0xff] }
 0x561   :  { %5640 = vmatprep.subr.mxu0 %v4801_v21 }
 0x601   :  { %v5534_v44 = vpop.f32.mrf.mxu0 }
 0x602   :  { %v2205_v45 = vadd.f32 %v5534_v44, %v4751_v43 }
 0x603   :  { %v2199_v46 = vpop.f32.mrf.mxu0 }
 0x604   :  { %v2200_v47 = vadd.f32 %v4751_v43, %v2199_v46  ;;  %v2209_v49 = vmax.f32 %v2205_v45, 0.0 }
 0x606   :  { %v2208_v48 = vmax.f32 %v2200_v47, 0.0 }
 0x608   :  { %5567 = vmatprep.mubr.f32.mxu1 %v2208_v48 }
 0x609   :  { %5568 = vmatmul.mubr.f32.vlgmr.msra.gmra.mxu1 %v2209_v49 }
 0x60a   :  { %5606 = vmatpush3.msra.mxu1 %v4785_v51  ;;  %v2332_v51 = vld [vmem:[%s7225_s9] sm:$0x1] }
 0x60b   :  { %5607 = vmatprep.subr.mxu1 %v4784_v53 }
 0x60c   :  { %5608 = vmatpush3.msra.mxu1 %v4784_v53 }
 0x60d   :  { %5609 = vmatprep.subr.mxu1 %v4783_v55 }
 0x60e   :  { %5610 = vmatpush3.msra.mxu1 %v4783_v55  ;;  %v4753_v55 = vld [vmem:[%s7226_s10] ss:$0 sm:$0xff] }
 0x60f   :  { %5611 = vmatprep.subr.mxu1 %v4782_v57 }
 0x610   :  { %5612 = vmatpush3.msra.mxu1 %v4782_v57 }
 0x611   :  { %5613 = vmatprep.subr.mxu1 %v4781_v59 }
 0x612   :  { %5614 = vmatpush3.msra.mxu1 %v4781_v59 }
 0x613   :  { %5615 = vmatprep.subr.mxu1 %v4780_v61 }
 0x614   :  { %5616 = vmatpush3.msra.mxu1 %v4780_v61  ;;  %v5985_v61 = vld [vmem:[%s7216_s0 + $0x8] sm:$0xff] }
 0x615   :  { %5617 = vmatprep.subr.mxu1 %v4779_v63 }
 0x616   :  { %5618 = vmatpush3.msra.mxu1 %v4779_v63  ;;  %v4800_v63 = vld [vmem:[%s7217_s1 + $0x370] sm:$0xff] }
 0x617   :  { %5619 = vmatprep.subr.mxu1 %v4778_v1 }
 0x618   :  { %5620 = vmatpush3.msra.mxu1 %v4778_v1  ;;  %v4815_v1 = vld [vmem:[%s7217_s1 + $0x3e8] sm:$0xff] }
 0x619   :  { %5621 = vmatprep.subr.mxu1 %v4777_v5 }
 0x61a   :  { %5622 = vmatpush3.msra.mxu1 %v4777_v5  ;;  %v4814_v5 = vld [vmem:[%s7217_s1 + $0x3e0] sm:$0xff] }
 0x61b   :  { %5623 = vmatprep.subr.mxu1 %v4776_v7 }
 0x61c   :  { %5624 = vmatpush3.msra.mxu1 %v4776_v7  ;;  %v4813_v7 = vld [vmem:[%s7217_s1 + $0x3d8] sm:$0xff] }
 0x61d   :  { %5625 = vmatprep.subr.mxu1 %v4775_v11 }
 0x61e   :  { %5626 = vmatpush3.msra.mxu1 %v4775_v11  ;;  %v4812_v11 = vld [vmem:[%s7217_s1 + $0x3d0] sm:$0xff] }
 0x61f   :  { %5627 = vmatprep.subr.mxu1 %v4774_v13 }
 0x620   :  { %5628 = vmatpush3.msra.mxu1 %v4774_v13  ;;  %v4811_v13 = vld [vmem:[%s7217_s1 + $0x3c8] sm:$0xff] }
 0x621   :  { %5629 = vmatprep.subr.mxu1 %v4773_v15 }
 0x622   :  { %5630 = vmatpush3.msra.mxu1 %v4773_v15  ;;  %v4810_v15 = vld [vmem:[%s7217_s1 + $0x3c0] sm:$0xff] }
 0x623   :  { %5631 = vmatprep.subr.mxu1 %v4772_v17 }
 0x624   :  { %5632 = vmatpush3.msra.mxu1 %v4772_v17  ;;  %v4809_v17 = vld [vmem:[%s7217_s1 + $0x3b8] sm:$0xff] }
 0x625   :  { %5633 = vmatprep.subr.mxu1 %v4771_v19 }
 0x626   :  { %5634 = vmatpush3.msra.mxu1 %v4771_v19  ;;  %v4808_v19 = vld [vmem:[%s7217_s1 + $0x3b0] sm:$0xff] }
 0x627   :  { %5635 = vmatprep.subr.mxu1 %v4770_v20 }
 0x628   :  { %5636 = vmatpush3.msra.mxu1 %v4770_v20  ;;  %v4807_v20 = vld [vmem:[%s7217_s1 + $0x3a8] sm:$0xff] }
 0x629   :  { %5675 = vmatprep.subr.mxu1 %v4817_v22 }
 0x6c9   :  { %v5569_v24 = vpop.f32.mrf.mxu1 }
 0x6ca   :  { %v2305_v25 = vadd.f32 %v5569_v24, %v4752_v23  ;;  %v4805_v24 = vld [vmem:[%s7217_s1 + $0x398] sm:$0xff] }
 0x6cb   :  { %v2299_v26 = vpop.f32.mrf.mxu1 }
 0x6cc   :  { %v2300_v27 = vadd.f32 %v4752_v23, %v2299_v26  ;;  %v2309_v28 = vadd.f32 %v2305_v25, %v6635_v38  ;;  %v4789_v23 = vld [vmem:[%s7217_s1 + $0x318] sm:$0xff]  ;;  %v4788_v25 = vld [vmem:[%s7217_s1 + $0x310] sm:$0xff] }
 0x6cd   :  { %v4804_v26 = vld [vmem:[%s7217_s1 + $0x390] sm:$0xff] }
 0x6ce   :  { %v2308_v29 = vadd.f32 %v2300_v27, %v6633_v37  ;;  %v4787_v27 = vld [vmem:[%s7217_s1 + $0x308] sm:$0xff] }
 0x6d0   :  { %v2310_v30 = vadd.f32 %v2309_v28, %v2308_v29 }
 0x6d2   :  { %v2311_v32 = vrot.slane %v2310_v30, 4 }
 0x6d4   :  { %v2312_v34 = vadd.f32 %v2311_v32, %v2310_v30  ;;  %v4802_v30 = vld [vmem:[%s7217_s1 + $0x380] sm:$0xff] }
 0x6d6   :  { %v2313_v35 = vrot.slane %v2312_v34, 2 }
 0x6d8   :  { %v2314_v9 = vadd.f32 %v2313_v35, %v2312_v34 }
 0x6da   :  { %v2315_v10 = vrot.slane %v2314_v9, 1 }
 0x6dc   :  { %v2316_v36 = vadd.f32 %v2315_v10, %v2314_v9 }
 0x6de   :  { %v2317_v39 = vmul.f32 0.0625, %v2316_v36 }
 0x6e0   :  { %v2318_v40 = vsub.f32 %v2308_v29, %v2317_v39  ;;  %v2319_v41 = vsub.f32 %v2309_v28, %v2317_v39  ;;  %v4803_v28 = vld [vmem:[%s7217_s1 + $0x388] sm:$0xff]  ;;  %v4786_v29 = vld [vmem:[%s7217_s1 + $0x300] sm:$0xff] }
 0x6e2   :  { %v2320_v42 = vmul.f32 %v2318_v40, %v2318_v40  ;;  %v2321_v43 = vmul.f32 %v2319_v41, %v2319_v41 }
 0x6e4   :  { %v2322_v44 = vadd.f32 %v2321_v43, %v2320_v42 }
 0x6e6   :  { %v2323_v45 = vrot.slane %v2322_v44, 4 }
 0x6e8   :  { %v2324_v46 = vadd.f32 %v2323_v45, %v2322_v44 }
 0x6ea   :  { %v2325_v47 = vrot.slane %v2324_v46, 2 }
 0x6ec   :  { %v2326_v48 = vadd.f32 %v2325_v47, %v2324_v46 }
 0x6ee   :  { %v2327_v38 = vrot.slane %v2326_v48, 1 }
 0x6f0   :  { %v2328_v49 = vadd.f32 %v2327_v38, %v2326_v48 }
 0x6f2   :  { %v2329_v37 = vmul.f32 0.0625, %v2328_v49 }
 0x6f4   :  { %v2330_v50 = vadd.f32 1e-05, %v2329_v37 }
 0x6f6   :  { %5946 = vrsqrt.f32 %v2330_v50 }
 0x703   :  { %v5947_v52 = vpop.eup %5946 }
 0x704   :  { %v2333_v53 = vmul.f32 %v5947_v52, %v2332_v51 }
 0x706   :  { %v2337_v54 = vrot.slane %v2333_v53, %v6627_v31 }
 0x708   :  { %v2338_v56 = vmul.f32 %v2337_v54, %v2318_v40  ;;  %v2339_v57 = vmul.f32 %v2337_v54, %v2319_v41 }
 0x70a   :  { %v2347_v58 = vadd.f32 %v4753_v55, %v2338_v56  ;;  %v2348_v59 = vadd.f32 %v4753_v55, %v2339_v57 }
 0x70c   :  { %v6769_v60 = vadd.f32 %v6621_v4, %v2347_v58  ;;  %v6774_v62 = vadd.f32 %v5985_v61, %v2348_v59  ;;  %v4816_v4 = vld [vmem:[%s7217_s1 + $0x3f0] sm:$0xff] }
 0x70e   :  { %5602 = vmatprep.mubr.f32.mxu0 %v6769_v60  ;;  %5637 = vmatprep.mubr.f32.mxu1 %v6769_v60 }
 0x70f   :  { %5603 = vmatmul.mubr.f32.vlgmr.msra.gmra.mxu0 %v6774_v62  ;;  %5638 = vmatmul.mubr.f32.vlgmr.msra.gmra.mxu1 %v6774_v62 }
 0x710   :  { %5641 = vmatpush3.msra.mxu0 %v4801_v21  ;;  %5676 = vmatpush3.msra.mxu1 %v4817_v22  ;;  %v4790_v21 = vld [vmem:[%s7217_s1 + $0x320] sm:$0xff] }
 0x711   :  { %5642 = vmatprep.subr.mxu0 %v4800_v63  ;;  %5672 = vmatprep.mubr.f32.mxu0 %v6769_v60  ;;  %v4806_v22 = vld [vmem:[%s7217_s1 + $0x3a0] sm:$0xff] }
 0x712   :  { %5677 = vmatprep.subr.mxu1 %v4816_v4  ;;  %5707 = vmatprep.mubr.f32.mxu1 %v6769_v60 }
 0x713   :  { %5643 = vmatpush3.msra.mxu0 %v4800_v63  ;;  %5678 = vmatpush3.msra.mxu1 %v4816_v4 }
 0x714   :  { %5644 = vmatprep.subr.mxu0 %v4799_v0  ;;  %5679 = vmatprep.subr.mxu1 %v4815_v1 }
 0x715   :  { %5645 = vmatpush3.msra.mxu0 %v4799_v0  ;;  %5680 = vmatpush3.msra.mxu1 %v4815_v1 }
 0x716   :  { %5646 = vmatprep.subr.mxu0 %v4798_v3  ;;  %5681 = vmatprep.subr.mxu1 %v4814_v5 }
 0x717   :  { %5647 = vmatpush3.msra.mxu0 %v4798_v3  ;;  %5682 = vmatpush3.msra.mxu1 %v4814_v5 }
 0x718   :  { %5648 = vmatprep.subr.mxu0 %v4797_v6  ;;  %5683 = vmatprep.subr.mxu1 %v4813_v7 }
 0x719   :  { %5649 = vmatpush3.msra.mxu0 %v4797_v6  ;;  %5684 = vmatpush3.msra.mxu1 %v4813_v7 }
 0x71a   :  { %5650 = vmatprep.subr.mxu0 %v4796_v8  ;;  %5685 = vmatprep.subr.mxu1 %v4812_v11 }
 0x71b   :  { %5651 = vmatpush3.msra.mxu0 %v4796_v8  ;;  %5686 = vmatpush3.msra.mxu1 %v4812_v11 }
 0x71c   :  { %5652 = vmatprep.subr.mxu0 %v4795_v12  ;;  %5687 = vmatprep.subr.mxu1 %v4811_v13 }
 0x71d   :  { %5653 = vmatpush3.msra.mxu0 %v4795_v12  ;;  %5688 = vmatpush3.msra.mxu1 %v4811_v13 }
 0x71e   :  { %5654 = vmatprep.subr.mxu0 %v4794_v14  ;;  %5689 = vmatprep.subr.mxu1 %v4810_v15 }
 0x71f   :  { %5655 = vmatpush3.msra.mxu0 %v4794_v14  ;;  %5690 = vmatpush3.msra.mxu1 %v4810_v15 }
 0x720   :  { %5656 = vmatprep.subr.mxu0 %v4793_v16  ;;  %5691 = vmatprep.subr.mxu1 %v4809_v17 }
 0x721   :  { %5657 = vmatpush3.msra.mxu0 %v4793_v16  ;;  %5692 = vmatpush3.msra.mxu1 %v4809_v17 }
 0x722   :  { %5658 = vmatprep.subr.mxu0 %v4792_v18  ;;  %5693 = vmatprep.subr.mxu1 %v4808_v19 }
 0x723   :  { %5659 = vmatpush3.msra.mxu0 %v4792_v18  ;;  %5694 = vmatpush3.msra.mxu1 %v4808_v19 }
 0x724   :  { %5660 = vmatprep.subr.mxu0 %v4791_v33  ;;  %5695 = vmatprep.subr.mxu1 %v4807_v20 }
 0x725   :  { %5661 = vmatpush3.msra.mxu0 %v4791_v33  ;;  %5696 = vmatpush3.msra.mxu1 %v4807_v20 }
 0x726   :  { %5662 = vmatprep.subr.mxu0 %v4790_v21  ;;  %5697 = vmatprep.subr.mxu1 %v4806_v22 }
 0x727   :  { %5663 = vmatpush3.msra.mxu0 %v4790_v21  ;;  %5698 = vmatpush3.msra.mxu1 %v4806_v22 }
 0x728   :  { %5664 = vmatprep.subr.mxu0 %v4789_v23  ;;  %5699 = vmatprep.subr.mxu1 %v4805_v24 }
 0x729   :  { %5665 = vmatpush3.msra.mxu0 %v4789_v23  ;;  %5700 = vmatpush3.msra.mxu1 %v4805_v24 }
 0x72a   :  { %5666 = vmatprep.subr.mxu0 %v4788_v25  ;;  %5701 = vmatprep.subr.mxu1 %v4804_v26 }
 0x72b   :  { %5667 = vmatpush3.msra.mxu0 %v4788_v25  ;;  %5702 = vmatpush3.msra.mxu1 %v4804_v26 }
 0x72c   :  { %5668 = vmatprep.subr.mxu0 %v4787_v27  ;;  %5703 = vmatprep.subr.mxu1 %v4803_v28 }
 0x72d   :  { %5669 = vmatpush3.msra.mxu0 %v4787_v27  ;;  %5704 = vmatpush3.msra.mxu1 %v4803_v28 }
 0x72e   :  { %5670 = vmatprep.subr.mxu0 %v4786_v29  ;;  %5705 = vmatprep.subr.mxu1 %v4802_v30 }
 0x72f   :  { %5671 = vmatpush3.msra.mxu0 %v4786_v29  ;;  %5706 = vmatpush3.msra.mxu1 %v4802_v30 }
 0x730   :  { %5673 = vmatmul.mubr.f32.vlgmr.msra.gmra.mxu0 %v6774_v62  ;;  %5708 = vmatmul.mubr.f32.vlgmr.msra.gmra.mxu1 %v6774_v62 }
 0x731   :  { %5715 = vmatprep.subr.mxu1 %v6030_v2  ;;  %5710 = vmatprep.subr.mxu0 %v6030_v2 }
 0x732   :  { %5717 = vmatprep.mubr.msk.f32.mxu1 %vm6031_vm0, %v6030_v2  ;;  %5712 = vmatprep.mubr.msk.f32.mxu0 %vm6031_vm0, %v6030_v2 }
 0x7cf   :  { %v6880_v32 = vpop.f32.mrf.mxu0  ;;  %v6884_v34 = vpop.f32.mrf.mxu1 }
 0x7d0   :  { %2794 = vrot.lane.b32.xlu1 %v6880_v32, %s6032_s27 }
 0x7d1   :  { %v6886_v35 = vpop.f32.mrf.mxu0  ;;  %v6892_v9 = vpop.f32.mrf.mxu1 }
 0x7d2   :  { %2717 = vrot.lane.b32.xlu0 %v6886_v35, %s6032_s27 }
 0x7d4   :  { %2948 = vrot.lane.b32.xlu1 %v6884_v34, %s6032_s27 }
 0x7d6   :  { %2871 = vrot.lane.b32.xlu0 %v6892_v9, %s6032_s27 }
 0x7f0   :  { %v6896_v10 = vpop.f32.mrf.mxu0  ;;  %v6900_v36 = vpop.f32.mrf.mxu1 }
 0x7f1   :  { %3102 = vrot.lane.b32.xlu1 %v6896_v10, %s6032_s27 }
 0x7f2   :  { %v6902_v39 = vpop.f32.mrf.mxu0  ;;  %v6908_v40 = vpop.f32.mrf.mxu1 }
 0x7f3   :  { %3025 = vrot.lane.b32.xlu0 %v6902_v39, %s6032_s27 }
 0x7f5   :  { %3256 = vrot.lane.b32.xlu1 %v6900_v36, %s6032_s27 }
 0x7f7   :  { %3179 = vrot.lane.b32.xlu0 %v6908_v40, %s6032_s27 }
 0x842   :  { %v2795_v41 = vpop.permute.xlu1 %2794 }
 0x843   :  { %5716 = vmatpush3.xpose.msk.msra.mxu1 %vm411_vm1, %v2795_v41 }
 0x844   :  { %v2718_v42 = vpop.permute.xlu0 %2717  ;;  %5725 = vmatprep.subr.mxu1 %v6030_v2 }
 0x845   :  { %5711 = vmatpush3.xpose.msk.msra.mxu0 %vm411_vm1, %v2718_v42 }
 0x846   :  { %5718 = vmatmul.mubr.msk.f32.vlgmr.msra.gmra.mxu1 %vm411_vm1, %v6880_v32  ;;  %v2949_v43 = vpop.permute.xlu1 %2948  ;;  %5720 = vmatprep.subr.mxu0 %v6030_v2 }
 0x847   :  { %5726 = vmatpush3.xpose.msk.msra.mxu1 %vm411_vm1, %v2949_v43  ;;  %5727 = vmatprep.mubr.msk.f32.mxu1 %vm6031_vm0, %v6030_v2 }
 0x848   :  { %5713 = vmatmul.mubr.msk.f32.vlgmr.msra.gmra.mxu0 %vm411_vm1, %v6886_v35  ;;  %v2872_v44 = vpop.permute.xlu0 %2871  ;;  %5735 = vmatprep.subr.mxu1 %v6030_v2 }
 0x849   :  { %5721 = vmatpush3.xpose.msk.msra.mxu0 %vm411_vm1, %v2872_v44  ;;  %5722 = vmatprep.mubr.msk.f32.mxu0 %vm6031_vm0, %v6030_v2 }
 0x84a   :  { %5728 = vmatmul.mubr.msk.f32.vlgmr.msra.gmra.mxu1 %vm411_vm1, %v6884_v34  ;;  %5730 = vmatprep.subr.mxu0 %v6030_v2 }
 0x84b   :  { %5737 = vmatprep.mubr.msk.f32.mxu1 %vm6031_vm0, %v6030_v2 }
 0x84c   :  { %5723 = vmatmul.mubr.msk.f32.vlgmr.msra.gmra.mxu0 %vm411_vm1, %v6892_v9 }
 0x84d   :  { %5732 = vmatprep.mubr.msk.f32.mxu0 %vm6031_vm0, %v6030_v2 }
 0x863   :  { %v3103_v45 = vpop.permute.xlu1 %3102 }
 0x864   :  { %5736 = vmatpush3.xpose.msk.msra.mxu1 %vm411_vm1, %v3103_v45 }
 0x865   :  { %v3026_v46 = vpop.permute.xlu0 %3025  ;;  %5745 = vmatprep.subr.mxu1 %v6030_v2 }
 0x866   :  { %5731 = vmatpush3.xpose.msk.msra.mxu0 %vm411_vm1, %v3026_v46 }
 0x867   :  { %5738 = vmatmul.mubr.msk.f32.vlgmr.msra.gmra.mxu1 %vm411_vm1, %v6896_v10  ;;  %v3257_v47 = vpop.permute.xlu1 %3256  ;;  %5740 = vmatprep.subr.mxu0 %v6030_v2 }
 0x868   :  { %5746 = vmatpush3.xpose.msk.msra.mxu1 %vm411_vm1, %v3257_v47  ;;  %5747 = vmatprep.mubr.msk.f32.mxu1 %vm6031_vm0, %v6030_v2 }
 0x869   :  { %5733 = vmatmul.mubr.msk.f32.vlgmr.msra.gmra.mxu0 %vm411_vm1, %v6902_v39  ;;  %v3180_v48 = vpop.permute.xlu0 %3179  ;;  %5755 = vmatprep.subr.mxu1 %v6030_v2 }
 0x86a   :  { %5741 = vmatpush3.xpose.msk.msra.mxu0 %vm411_vm1, %v3180_v48  ;;  %5742 = vmatprep.mubr.msk.f32.mxu0 %vm6031_vm0, %v6030_v2 }
 0x86b   :  { %5748 = vmatmul.mubr.msk.f32.vlgmr.msra.gmra.mxu1 %vm411_vm1, %v6900_v36  ;;  %5750 = vmatprep.subr.mxu0 %v6030_v2 }
 0x86c   :  { %5757 = vmatprep.mubr.msk.f32.mxu1 %vm6031_vm0, %v6030_v2 }
 0x86d   :  { %5743 = vmatmul.mubr.msk.f32.vlgmr.msra.gmra.mxu0 %vm411_vm1, %v6908_v40 }
 0x86e   :  { %5752 = vmatprep.mubr.msk.f32.mxu0 %vm6031_vm0, %v6030_v2 }
 0x906   :  { %v2866_v38 = vpop.f32.mrf.mxu1 }
 0x907   :  { %v3335_v49 = vsel %vm1025_vm2, %v2866_v38, -inf }
 0x908   :  { %v5719_v37 = vpop.f32.mrf.mxu1  ;;  %3336 = vmax.xlane.f32.xlu1 %v3335_v49  ;;  %v2789_v50 = vpop.f32.mrf.mxu0 }
 0x909   :  { %v3332_v51 = vsel %vm1025_vm2, %v2789_v50, -inf }
 0x90a   :  { %v3020_v52 = vpop.f32.mrf.mxu1  ;;  %3333 = vmax.xlane.f32.xlu0 %v3332_v51  ;;  %v5714_v53 = vpop.f32.mrf.mxu0 }
 0x90b   :  { %v3341_v58 = vsel %vm1025_vm2, %v3020_v52, -inf }
 0x90c   :  { %v2943_v54 = vpop.f32.mrf.mxu0  ;;  %v5729_v55 = vpop.f32.mrf.mxu1 }
 0x90d   :  { %v3338_v56 = vsel %vm1025_vm2, %v2943_v54, -inf }
 0x90e   :  { %3339 = vmax.xlane.f32.xlu0 %v3338_v56  ;;  %v5724_v57 = vpop.f32.mrf.mxu0 }
 0x912   :  { %3342 = vmax.xlane.f32.xlu0 %v3341_v58 }
 0x927   :  { %v3174_v59 = vpop.f32.mrf.mxu1 }
 0x928   :  { %v3347_v61 = vsel %vm1025_vm2, %v3174_v59, -inf }
 0x929   :  { %v5739_v63 = vpop.f32.mrf.mxu1  ;;  %3348 = vmax.xlane.f32.xlu0 %v3347_v61  ;;  %v3097_v4 = vpop.f32.mrf.mxu0 }
 0x92a   :  { %v3344_v0 = vsel %vm1025_vm2, %v3097_v4, -inf }
 0x92b   :  { %v3328_v1 = vpop.f32.mrf.mxu1  ;;  %3345 = vmax.xlane.f32.xlu1 %v3344_v0  ;;  %v5734_v3 = vpop.f32.mrf.mxu0 }
 0x92c   :  { %v3353_v5 = vsel %vm1025_vm2, %v3328_v1, -inf }
 0x92d   :  { %v5749_v6 = vpop.f32.mrf.mxu1  ;;  %3354 = vmax.xlane.f32.xlu0 %v3353_v5  ;;  %v3251_v7 = vpop.f32.mrf.mxu0 }
 0x92e   :  { %v3350_v8 = vsel %vm1025_vm2, %v3251_v7, -inf }
 0x92f   :  { %3351 = vmax.xlane.f32.xlu1 %v3350_v8  ;;  %v5744_v11 = vpop.f32.mrf.mxu0 }
 0x940   :  { %3420 = vrot.lane.b32.xlu1 %v6886_v35, %s6033_s28 }
 0x943   :  { %3496 = vrot.lane.b32.xlu0 %v6880_v32, %s6033_s28 }
 0x944   :  { %3572 = vrot.lane.b32.xlu1 %v6892_v9, %s6033_s28 }
 0x947   :  { %3724 = vrot.lane.b32.xlu0 %v6902_v39, %s6033_s28 }
 0x948   :  { %3648 = vrot.lane.b32.xlu1 %v6884_v34, %s6033_s28 }
 0x94c   :  { %3800 = vrot.lane.b32.xlu1 %v6896_v10, %s6033_s28 }
 0x991   :  { %v3337_v12 = vpop.xlane.xlu1 %3336 }
 0x992   :  { %v3357_v13 = vsub.f32 %v2866_v38, %v3337_v12 }
 0x993   :  { %v3334_v14 = vpop.xlane.xlu0 %3333 }
 0x994   :  { %v3366_v15 = vmul.f32 1.442695, %v3357_v13  ;;  %v3356_v16 = vsub.f32 %v2789_v50, %v3334_v14 }
 0x996   :  { %5948 = vpow2.f32 %v3366_v15  ;;  %v3364_v17 = vmul.f32 1.442695, %v3356_v16 }
 0x997   :  { %v3340_v18 = vpop.xlane.xlu0 %3339 }
 0x998   :  { %5950 = vpow2.f32 %v3364_v17  ;;  %v3358_v19 = vsub.f32 %v2943_v54, %v3340_v18 }
 0x99a   :  { %v3368_v33 = vmul.f32 1.442695, %v3358_v19 }
 0x99b   :  { %v3343_v20 = vpop.xlane.xlu0 %3342 }
 0x99c   :  { %5952 = vpow2.f32 %v3368_v33  ;;  %v3359_v21 = vsub.f32 %v3020_v52, %v3343_v20  ;;  %v4845_v33 = vld [vmem:[%s7218_s2 + $0x98] sm:$0xff] }
 0x99e   :  { %v3370_v22 = vmul.f32 1.442695, %v3359_v21 }
 0x9a0   :  { %5954 = vpow2.f32 %v3370_v22 }
 0x9a3   :  { %v5949_v23 = vpop.eup %5948 }
 0x9a4   :  { %v3383_v24 = vsel %vm1025_vm2, %v5949_v23, 0.0 }
 0x9a5   :  { %v5951_v25 = vpop.eup %5950  ;;  %3384 = vadd.xlane.f32.xlu0 %v3383_v24  ;;  %v4844_v24 = vld [vmem:[%s7218_s2 + $0x90] sm:$0xff] }
 0x9a6   :  { %v3380_v26 = vsel %vm1025_vm2, %v5951_v25, 0.0 }
 0x9a7   :  { %3381 = vadd.xlane.f32.xlu1 %v3380_v26  ;;  %v4849_v26 = vld [vmem:[%s7218_s2 + $0xb8] sm:$0xff] }
 0x9a9   :  { %v6982_v27 = vpop.eup %5952 }
 0x9aa   :  { %v3386_v28 = vsel %vm1025_vm2, %v6982_v27, 0.0 }
 0x9ab   :  { %3387 = vadd.xlane.f32.xlu1 %v3386_v28  ;;  %v4847_v28 = vld [vmem:[%s7218_s2 + $0xa8] sm:$0xff] }
 0x9ad   :  { %v6986_v29 = vpop.eup %5954 }
 0x9ae   :  { %v3389_v30 = vsel %vm1025_vm2, %v6986_v29, 0.0 }
 0x9af   :  { %3390 = vadd.xlane.f32.xlu0 %v3389_v30  ;;  %v4853_v30 = vld [vmem:[%s7218_s2 + $0xd8] sm:$0xff] }
 0x9b2   :  { %v3349_v32 = vpop.xlane.xlu0 %3348 }
 0x9b3   :  { %v3361_v34 = vsub.f32 %v3174_v59, %v3349_v32  ;;  %v4857_v32 = vld [vmem:[%s7218_s2 + $0xf8] sm:$0xff] }
 0x9b4   :  { %v3346_v35 = vpop.xlane.xlu1 %3345 }
 0x9b5   :  { %v3374_v9 = vmul.f32 1.442695, %v3361_v34  ;;  %v3360_v10 = vsub.f32 %v3097_v4, %v3346_v35 }
 0x9b6   :  { %v3355_v39 = vpop.xlane.xlu0 %3354 }
 0x9b7   :  { %5956 = vpow2.f32 %v3374_v9  ;;  %v3372_v41 = vmul.f32 1.442695, %v3360_v10  ;;  %v3363_v42 = vsub.f32 %v3328_v1, %v3355_v39  ;;  %v4852_v10 = vld [vmem:[%s7218_s2 + $0xd0] sm:$0xff] }
 0x9b8   :  { %v3352_v43 = vpop.xlane.xlu1 %3351 }
 0x9b9   :  { %5958 = vpow2.f32 %v3372_v41  ;;  %v3378_v44 = vmul.f32 1.442695, %v3363_v42  ;;  %v3362_v45 = vsub.f32 %v3251_v7, %v3352_v43  ;;  %v4851_v41 = vld [vmem:[%s7218_s2 + $0xc8] sm:$0xff]  ;;  %v4850_v43 = vld [vmem:[%s7218_s2 + $0xc0] sm:$0xff] }
 0x9ba   :  { %v3497_v46 = vpop.permute.xlu0 %3496 }
 0x9bb   :  { %5960 = vpow2.f32 %v3378_v44  ;;  %v3376_v47 = vmul.f32 1.442695, %v3362_v45  ;;  %5756 = vmatpush3.msra.mxu1 %v3497_v46  ;;  %v4856_v46 = vld [vmem:[%s7218_s2 + $0xf0] sm:$0xff] }
 0x9bc   :  { %v3421_v48 = vpop.permute.xlu1 %3420  ;;  %5765 = vmatprep.subr.mxu1 %v6030_v2 }
 0x9bd   :  { %5962 = vpow2.f32 %v3376_v47  ;;  %5751 = vmatpush3.msra.mxu0 %v3421_v48  ;;  %v4855_v48 = vld [vmem:[%s7218_s2 + $0xe8] sm:$0xff] }
 0x9be   :  { %5760 = vmatprep.subr.mxu0 %v6030_v2  ;;  %v3725_v57 = vpop.permute.xlu0 %3724 }
 0x9c0   :  { %v3573_v55 = vpop.permute.xlu1 %3572 }
 0x9c4   :  { %v5957_v38 = vpop.eup %5956  ;;  %v3649_v56 = vpop.permute.xlu1 %3648 }
 0x9c5   :  { %v3395_v49 = vsel %vm1025_vm2, %v5957_v38, 0.0 }
 0x9c6   :  { %v5959_v37 = vpop.eup %5958  ;;  %3396 = vadd.xlane.f32.xlu0 %v3395_v49 }
 0x9c7   :  { %v3392_v50 = vsel %vm1025_vm2, %v5959_v37, 0.0 }
 0x9c8   :  { %v6994_v51 = vpop.eup %5960  ;;  %3393 = vadd.xlane.f32.xlu1 %v3392_v50  ;;  %v3801_v58 = vpop.permute.xlu1 %3800 }
 0x9c9   :  { %v3401_v52 = vsel %vm1025_vm2, %v6994_v51, 0.0 }
 0x9ca   :  { %v6998_v53 = vpop.eup %5962  ;;  %3402 = vadd.xlane.f32.xlu0 %v3401_v52 }
 0x9cb   :  { %v3398_v54 = vsel %vm1025_vm2, %v6998_v53, 0.0 }
 0x9cc   :  { %3399 = vadd.xlane.f32.xlu1 %v3398_v54 }
 0x9dd   :  { %3952 = vrot.lane.b32.xlu1 %v6900_v36, %s6033_s28 }
 0x9e0   :  { %3876 = vrot.lane.b32.xlu0 %v6908_v40, %s6033_s28 }
 0xa2e   :  { %v3385_v59 = vpop.xlane.xlu0 %3384 }
 0xa2f   :  { %5964 = vrcp.f32 %v3385_v59  ;;  %v4881_v59 = vld [vmem:[%s7221_s5 + $0xe0] sm:$0xff] }
 0xa30   :  { %v3382_v61 = vpop.xlane.xlu1 %3381 }
 0xa31   :  { %5966 = vrcp.f32 %v3382_v61  ;;  %v4880_v61 = vld [vmem:[%s7221_s5 + $0xd8] sm:$0xff] }
 0xa34   :  { %v3388_v63 = vpop.xlane.xlu1 %3387 }
 0xa35   :  { %5968 = vrcp.f32 %v3388_v63  ;;  %v4879_v63 = vld [vmem:[%s7221_s5 + $0xd0] sm:$0xff] }
 0xa38   :  { %v3391_v4 = vpop.xlane.xlu0 %3390 }
 0xa39   :  { %5970 = vrcp.f32 %v3391_v4  ;;  %v4878_v4 = vld [vmem:[%s7221_s5 + $0xc8] sm:$0xff] }
 0xa3c   :  { %v5965_v0 = vpop.eup %5964 }
 0xa3d   :  { %v3413_v1 = vmul.f32 %v5965_v0, %v5949_v23  ;;  %v4877_v0 = vld [vmem:[%s7221_s5 + $0xc0] sm:$0xff] }
 0xa3e   :  { %v5967_v3 = vpop.eup %5966 }
 0xa3f   :  { %5758 = vmatmul.mubr.msk.f32.vlgmr.msra.gmra.mxu1 %vm1025_vm2, %v3413_v1  ;;  %v3412_v36 = vmul.f32 %v5967_v3, %v5951_v25  ;;  %v4843_v25 = vld [vmem:[%s7218_s2 + $0x88] sm:$0xff]  ;;  %v4876_v1 = vld [vmem:[%s7221_s5 + $0xb8] sm:$0xff]  ;;  %v4875_v3 = vld [vmem:[%s7221_s5 + $0xb0] sm:$0xff] }
 0xa40   :  { %5766 = vmatpush3.msra.mxu1 %v3649_v56  ;;  %5767 = vmatprep.mubr.msk.f32.mxu1 %vm6031_vm0, %v6030_v2  ;;  %v4884_v56 = vld [vmem:[%s7221_s5 + $0xf8] sm:$0xff] }
 0xa41   :  { %5753 = vmatmul.mubr.msk.f32.vlgmr.msra.gmra.mxu0 %vm1025_vm2, %v3412_v36  ;;  %5775 = vmatprep.subr.mxu1 %v6030_v2  ;;  %v4874_v36 = vld [vmem:[%s7221_s5 + $0xa8] sm:$0xff] }
 0xa42   :  { %v5969_v40 = vpop.eup %5968  ;;  %5761 = vmatpush3.msra.mxu0 %v3573_v55  ;;  %5762 = vmatprep.mubr.msk.f32.mxu0 %vm6031_vm0, %v6030_v2 }
 0xa43   :  { %5770 = vmatprep.subr.mxu0 %v6030_v2  ;;  %v3414_v5 = vmul.f32 %v5969_v40, %v6982_v27  ;;  %v4848_v27 = vld [vmem:[%s7218_s2 + $0xb0] sm:$0xff]  ;;  %v4873_v40 = vld [vmem:[%s7221_s5 + $0xa0] sm:$0xff] }
 0xa45   :  { %5763 = vmatmul.mubr.msk.f32.vlgmr.msra.gmra.mxu0 %vm1025_vm2, %v3414_v5  ;;  %v4872_v5 = vld [vmem:[%s7221_s5 + $0x98] sm:$0xff] }
 0xa46   :  { %v5971_v6 = vpop.eup %5970  ;;  %5771 = vmatpush3.msra.mxu0 %v3725_v57  ;;  %5772 = vmatprep.mubr.msk.f32.mxu0 %vm6031_vm0, %v6030_v2  ;;  %v4883_v57 = vld [vmem:[%s7221_s5 + $0xf0] sm:$0xff] }
 0xa47   :  { %v3415_v7 = vmul.f32 %v5971_v6, %v6986_v29  ;;  %5780 = vmatprep.subr.mxu0 %v6030_v2  ;;  %v4846_v29 = vld [vmem:[%s7218_s2 + $0xa0] sm:$0xff]  ;;  %v4871_v6 = vld [vmem:[%s7221_s5 + $0x90] sm:$0xff] }
 0xa49   :  { %5768 = vmatmul.mubr.msk.f32.vlgmr.msra.gmra.mxu1 %vm1025_vm2, %v3415_v7  ;;  %v4870_v7 = vld [vmem:[%s7221_s5 + $0x88] sm:$0xff] }
 0xa4a   :  { %5776 = vmatpush3.msra.mxu1 %v3801_v58  ;;  %5777 = vmatprep.mubr.msk.f32.mxu1 %vm6031_vm0, %v6030_v2  ;;  %v4882_v58 = vld [vmem:[%s7221_s5 + $0xe8] sm:$0xff] }
 0xa4b   :  { %5785 = vmatprep.subr.mxu1 %v6030_v2 }
 0xa4f   :  { %v3397_v8 = vpop.xlane.xlu0 %3396 }
 0xa50   :  { %5972 = vrcp.f32 %v3397_v8  ;;  %v4869_v8 = vld [vmem:[%s7221_s5 + $0x80] sm:$0xff] }
 0xa51   :  { %v3394_v11 = vpop.xlane.xlu1 %3393 }
 0xa52   :  { %5974 = vrcp.f32 %v3394_v11  ;;  %v4902_v11 = vld [vmem:[%s7223_s7 + $0xf8] sm:$0xff] }
 0xa53   :  { %v3403_v12 = vpop.xlane.xlu0 %3402 }
 0xa54   :  { %5976 = vrcp.f32 %v3403_v12  ;;  %v4901_v12 = vld [vmem:[%s7223_s7 + $0xf0] sm:$0xff] }
 0xa55   :  { %v3400_v13 = vpop.xlane.xlu1 %3399 }
 0xa56   :  { %5978 = vrcp.f32 %v3400_v13  ;;  %v4900_v13 = vld [vmem:[%s7223_s7 + $0xe8] sm:$0xff] }
 0xa57   :  { %v3877_v20 = vpop.permute.xlu0 %3876 }
 0xa59   :  { %v3953_v17 = vpop.permute.xlu1 %3952 }
 0xa5d   :  { %v5973_v14 = vpop.eup %5972 }
 0xa5e   :  { %v3417_v15 = vmul.f32 %v5973_v14, %v5957_v38  ;;  %v4854_v38 = vld [vmem:[%s7218_s2 + $0xe0] sm:$0xff] }
 0xa5f   :  { %v5975_v16 = vpop.eup %5974  ;;  %v4899_v14 = vld [vmem:[%s7223_s7 + $0xe0] sm:$0xff] }
 0xa60   :  { %5778 = vmatmul.mubr.msk.f32.vlgmr.msra.gmra.mxu1 %vm1025_vm2, %v3417_v15  ;;  %v3416_v18 = vmul.f32 %v5975_v16, %v5959_v37  ;;  %v4898_v15 = vld [vmem:[%s7223_s7 + $0xd8] sm:$0xff]  ;;  %v4897_v16 = vld [vmem:[%s7223_s7 + $0xd0] sm:$0xff] }
 0xa61   :  { %v5977_v19 = vpop.eup %5976  ;;  %5786 = vmatpush3.msra.mxu1 %v3953_v17  ;;  %5787 = vmatprep.mubr.msk.f32.mxu1 %vm6031_vm0, %v6030_v2  ;;  %v4896_v17 = vld [vmem:[%s7223_s7 + $0xc8] sm:$0xff] }
 0xa62   :  { %5773 = vmatmul.mubr.msk.f32.vlgmr.msra.gmra.mxu0 %vm1025_vm2, %v3416_v18  ;;  %v3419_v21 = vmul.f32 %v5977_v19, %v6994_v51  ;;  %5801 = vmatprep.subr.mxu1 %v4849_v26  ;;  %v4895_v18 = vld [vmem:[%s7223_s7 + $0xc0] sm:$0xff]  ;;  %v4894_v19 = vld [vmem:[%s7223_s7 + $0xb8] sm:$0xff] }
 0xa63   :  { %v5979_v22 = vpop.eup %5978  ;;  %5781 = vmatpush3.msra.mxu0 %v3877_v20  ;;  %5782 = vmatprep.mubr.msk.f32.mxu0 %vm6031_vm0, %v6030_v2  ;;  %v4842_v2 = vld [vmem:[%s7218_s2 + $0x80] sm:$0xff]  ;;  %v4892_v20 = vld [vmem:[%s7223_s7 + $0xa8] sm:$0xff] }
 0xa64   :  { %5788 = vmatmul.mubr.msk.f32.vlgmr.msra.gmra.mxu1 %vm1025_vm2, %v3419_v21  ;;  %v3418_v23 = vmul.f32 %v5979_v22, %v6998_v53  ;;  %5790 = vmatprep.subr.mxu0 %v4845_v33  ;;  %v4891_v21 = vld [vmem:[%s7223_s7 + $0xa0] sm:$0xff] }
 0xa65   :  { %5802 = vmatpush3.msra.mxu1 %v4849_v26 }
 0xa66   :  { %5783 = vmatmul.mubr.msk.f32.vlgmr.msra.gmra.mxu0 %vm1025_vm2, %v3418_v23  ;;  %5803 = vmatprep.subr.mxu1 %v4848_v27 }
 0xa67   :  { %5791 = vmatpush3.msra.mxu0 %v4845_v33  ;;  %5804 = vmatpush3.msra.mxu1 %v4848_v27  ;;  %v4893_v33 = vld [vmem:[%s7223_s7 + $0xb0] sm:$0xff] }
 0xa68   :  { %5792 = vmatprep.subr.mxu0 %v4844_v24  ;;  %5805 = vmatprep.subr.mxu1 %v4847_v28 }
 0xa69   :  { %5793 = vmatpush3.msra.mxu0 %v4844_v24  ;;  %5806 = vmatpush3.msra.mxu1 %v4847_v28 }
 0xa6a   :  { %5794 = vmatprep.subr.mxu0 %v4843_v25  ;;  %5807 = vmatprep.subr.mxu1 %v4846_v29 }
 0xa6b   :  { %5795 = vmatpush3.msra.mxu0 %v4843_v25  ;;  %5808 = vmatpush3.msra.mxu1 %v4846_v29 }
 0xa6c   :  { %5796 = vmatprep.subr.mxu0 %v4842_v2  ;;  %5823 = vmatprep.subr.mxu1 %v4857_v32 }
 0xa6d   :  { %5797 = vmatpush3.msra.mxu0 %v4842_v2 }
 0xa6e   :  { %5812 = vmatprep.subr.mxu0 %v4853_v30 }
 0xaff   :  { %v3568_v34 = vpop.f32.mrf.mxu1 }
 0xb01   :  { %v3492_v35 = vpop.f32.mrf.mxu0  ;;  %v5759_v9 = vpop.f32.mrf.mxu1 }
 0xb02   :  { %5798 = vmatprep.mubr.msk.f32.mxu0 %vm411_vm1, %v3492_v35 }
 0xb03   :  { %v5754_v39 = vpop.f32.mrf.mxu0  ;;  %5799 = vmatmul.mubr.msk.f32.vlgmr.msra.gmra.mxu0 %vm411_vm1, %v3568_v34 }
 0xb04   :  { %5813 = vmatpush3.msra.mxu0 %v4853_v30 }
 0xb05   :  { %v3644_v42 = vpop.f32.mrf.mxu0  ;;  %5814 = vmatprep.subr.mxu0 %v4852_v10 }
 0xb06   :  { %5809 = vmatprep.mubr.msk.f32.mxu1 %vm411_vm1, %v3644_v42  ;;  %5815 = vmatpush3.msra.mxu0 %v4852_v10 }
 0xb07   :  { %v5764_v44 = vpop.f32.mrf.mxu0  ;;  %5816 = vmatprep.subr.mxu0 %v4851_v41 }
 0xb08   :  { %5817 = vmatpush3.msra.mxu0 %v4851_v41 }
 0xb09   :  { %v3720_v45 = vpop.f32.mrf.mxu1  ;;  %5818 = vmatprep.subr.mxu0 %v4850_v43 }
 0xb0a   :  { %5810 = vmatmul.mubr.msk.f32.vlgmr.msra.gmra.mxu1 %vm411_vm1, %v3720_v45  ;;  %5819 = vmatpush3.msra.mxu0 %v4850_v43 }
 0xb0b   :  { %v5769_v47 = vpop.f32.mrf.mxu1  ;;  %5824 = vmatpush3.msra.mxu1 %v4857_v32  ;;  %5834 = vmatprep.subr.mxu0 %v4884_v56 }
 0xb0c   :  { %5825 = vmatprep.subr.mxu1 %v4856_v46 }
 0xb0d   :  { %5826 = vmatpush3.msra.mxu1 %v4856_v46 }
 0xb0e   :  { %5827 = vmatprep.subr.mxu1 %v4855_v48 }
 0xb0f   :  { %5828 = vmatpush3.msra.mxu1 %v4855_v48 }
 0xb10   :  { %5829 = vmatprep.subr.mxu1 %v4854_v38 }
 0xb11   :  { %5830 = vmatpush3.msra.mxu1 %v4854_v38 }
 0xb12   :  { %5869 = vmatprep.subr.mxu1 %v4902_v11 }
 0xb20   :  { %v3872_v49 = vpop.f32.mrf.mxu1 }
 0xb22   :  { %v3796_v37 = vpop.f32.mrf.mxu0  ;;  %v5779_v50 = vpop.f32.mrf.mxu1 }
 0xb23   :  { %5820 = vmatprep.mubr.msk.f32.mxu0 %vm411_vm1, %v3796_v37 }
 0xb24   :  { %v5774_v51 = vpop.f32.mrf.mxu0  ;;  %v4024_v52 = vpop.f32.mrf.mxu1  ;;  %5821 = vmatmul.mubr.msk.f32.vlgmr.msra.gmra.mxu0 %vm411_vm1, %v3872_v49 }
 0xb25   :  { %5835 = vmatpush3.msra.mxu0 %v4884_v56 }
 0xb26   :  { %v3948_v53 = vpop.f32.mrf.mxu0  ;;  %v5789_v54 = vpop.f32.mrf.mxu1  ;;  %5836 = vmatprep.subr.mxu0 %v4883_v57 }
 0xb27   :  { %5831 = vmatprep.mubr.msk.f32.mxu1 %vm411_vm1, %v3948_v53  ;;  %5837 = vmatpush3.msra.mxu0 %v4883_v57 }
 0xb28   :  { %v5784_v55 = vpop.f32.mrf.mxu0  ;;  %5832 = vmatmul.mubr.msk.f32.vlgmr.msra.gmra.mxu1 %vm411_vm1, %v4024_v52  ;;  %5838 = vmatprep.subr.mxu0 %v4882_v58 }
 0xb29   :  { %5839 = vmatpush3.msra.mxu0 %v4882_v58  ;;  %5870 = vmatpush3.msra.mxu1 %v4902_v11  ;;  %v4887_v11 = vld [vmem:[%s7223_s7 + $0x80] sm:$0xff] }
 0xb2a   :  { %5840 = vmatprep.subr.mxu0 %v4881_v59  ;;  %5871 = vmatprep.subr.mxu1 %v4901_v12 }
 0xb2b   :  { %5841 = vmatpush3.msra.mxu0 %v4881_v59  ;;  %5872 = vmatpush3.msra.mxu1 %v4901_v12  ;;  %v4886_v12 = vld [vmem:[%s7222_s6 + $0x1] ss:$0 sm:$0xff] }
 0xb2c   :  { %5842 = vmatprep.subr.mxu0 %v4880_v61  ;;  %5873 = vmatprep.subr.mxu1 %v4900_v13 }
 0xb2d   :  { %5843 = vmatpush3.msra.mxu0 %v4880_v61  ;;  %5874 = vmatpush3.msra.mxu1 %v4900_v13  ;;  %v4866_v61 = vld [vmem:[%s7219_s3 + $0x1] sm:$0x1] }
 0xb2e   :  { %5844 = vmatprep.subr.mxu0 %v4879_v63  ;;  %5875 = vmatprep.subr.mxu1 %v4899_v14 }
 0xb2f   :  { %5845 = vmatpush3.msra.mxu0 %v4879_v63  ;;  %5876 = vmatpush3.msra.mxu1 %v4899_v14 }
 0xb30   :  { %5846 = vmatprep.subr.mxu0 %v4878_v4  ;;  %5877 = vmatprep.subr.mxu1 %v4898_v15 }
 0xb31   :  { %5847 = vmatpush3.msra.mxu0 %v4878_v4  ;;  %5878 = vmatpush3.msra.mxu1 %v4898_v15 }
 0xb32   :  { %5848 = vmatprep.subr.mxu0 %v4877_v0  ;;  %5879 = vmatprep.subr.mxu1 %v4897_v16 }
 0xb33   :  { %5849 = vmatpush3.msra.mxu0 %v4877_v0  ;;  %5880 = vmatpush3.msra.mxu1 %v4897_v16 }
 0xb34   :  { %5850 = vmatprep.subr.mxu0 %v4876_v1  ;;  %5881 = vmatprep.subr.mxu1 %v4896_v17 }
 0xb35   :  { %5851 = vmatpush3.msra.mxu0 %v4876_v1  ;;  %5882 = vmatpush3.msra.mxu1 %v4896_v17  ;;  %v4868_v1 = vld [vmem:[%s7220_s4 + $0x1] ss:$0 sm:$0xff] }
 0xb36   :  { %5852 = vmatprep.subr.mxu0 %v4875_v3  ;;  %5883 = vmatprep.subr.mxu1 %v4895_v18 }
 0xb37   :  { %5853 = vmatpush3.msra.mxu0 %v4875_v3  ;;  %5884 = vmatpush3.msra.mxu1 %v4895_v18 }
 0xb38   :  { %5854 = vmatprep.subr.mxu0 %v4874_v36  ;;  %5885 = vmatprep.subr.mxu1 %v4894_v19 }
 0xb39   :  { %5855 = vmatpush3.msra.mxu0 %v4874_v36  ;;  %5886 = vmatpush3.msra.mxu1 %v4894_v19  ;;  %v4904_v19 = vld [vmem:[%s7224_s8 + $0x1] ss:$0 sm:$0xff] }
 0xb3a   :  { %5856 = vmatprep.subr.mxu0 %v4873_v40  ;;  %5887 = vmatprep.subr.mxu1 %v4893_v33 }
 0xb3b   :  { %5857 = vmatpush3.msra.mxu0 %v4873_v40  ;;  %5888 = vmatpush3.msra.mxu1 %v4893_v33 }
 0xb3c   :  { %5858 = vmatprep.subr.mxu0 %v4872_v5  ;;  %5889 = vmatprep.subr.mxu1 %v4892_v20 }
 0xb3d   :  { %5859 = vmatpush3.msra.mxu0 %v4872_v5  ;;  %5890 = vmatpush3.msra.mxu1 %v4892_v20 }
 0xb3e   :  { %5860 = vmatprep.subr.mxu0 %v4871_v6  ;;  %5891 = vmatprep.subr.mxu1 %v4891_v21 }
 0xb3f   :  { %5861 = vmatpush3.msra.mxu0 %v4871_v6  ;;  %5892 = vmatpush3.msra.mxu1 %v4891_v21  ;;  %v4890_v6 = vld [vmem:[%s7223_s7 + $0x98] sm:$0xff] }
 0xb40   :  { %5862 = vmatprep.subr.mxu0 %v4870_v7  ;;  %5893 = vmatprep.subr.mxu1 %v4890_v6 }
 0xb41   :  { %5863 = vmatpush3.msra.mxu0 %v4870_v7  ;;  %5894 = vmatpush3.msra.mxu1 %v4890_v6  ;;  %v4889_v7 = vld [vmem:[%s7223_s7 + $0x90] sm:$0xff] }
 0xb42   :  { %5864 = vmatprep.subr.mxu0 %v4869_v8  ;;  %5895 = vmatprep.subr.mxu1 %v4889_v7 }
 0xb43   :  { %5865 = vmatpush3.msra.mxu0 %v4869_v8  ;;  %5896 = vmatpush3.msra.mxu1 %v4889_v7  ;;  %v4888_v8 = vld [vmem:[%s7223_s7 + $0x88] sm:$0xff] }
 0xb44   :  { %5897 = vmatprep.subr.mxu1 %v4888_v8 }
 0xb45   :  { %5898 = vmatpush3.msra.mxu1 %v4888_v8 }
 0xb46   :  { %5899 = vmatprep.subr.mxu1 %v4887_v11 }
 0xb47   :  { %5900 = vmatpush3.msra.mxu1 %v4887_v11 }
 0xbc3   :  { %v5800_v22 = vpop.f32.mrf.mxu0 }
 0xbc5   :  { %v4117_v24 = vpop.f32.mrf.mxu0 }
 0xbca   :  { %v5811_v23 = vpop.f32.mrf.mxu1 }
 0xbcb   :  { %v4372_v26 = vadd.f32 %v5811_v23, %v5800_v22 }
 0xbcc   :  { %v4198_v25 = vpop.f32.mrf.mxu1 }
 0xbcd   :  { %v4369_v28 = vadd.f32 %v4198_v25, %v4117_v24 }
 0xbe4   :  { %v5822_v2 = vpop.f32.mrf.mxu0 }
 0xbe5   :  { %v4373_v29 = vadd.f32 %v5822_v2, %v4372_v26 }
 0xbe6   :  { %v4279_v27 = vpop.f32.mrf.mxu0 }
 0xbe7   :  { %v4370_v32 = vadd.f32 %v4369_v28, %v4279_v27 }
 0xbe8   :  { %v5833_v30 = vpop.f32.mrf.mxu1 }
 0xbe9   :  { %v4374_v34 = vadd.f32 %v5833_v30, %v4373_v29 }
 0xbea   :  { %v4360_v35 = vpop.f32.mrf.mxu1 }
 0xbeb   :  { %v4371_v9 = vadd.f32 %v4370_v32, %v4360_v35  ;;  %v4376_v10 = vadd.f32 %v4374_v34, %v6774_v62 }
 0xbed   :  { %v4375_v39 = vadd.f32 %v4371_v9, %v6769_v60 }
 0xbef   :  { %v4377_v41 = vadd.f32 %v4376_v10, %v4375_v39 }
 0xbf1   :  { %v4378_v42 = vrot.slane %v4377_v41, 4 }
 0xbf3   :  { %v4379_v43 = vadd.f32 %v4378_v42, %v4377_v41 }
 0xbf5   :  { %v4380_v44 = vrot.slane %v4379_v43, 2 }
 0xbf7   :  { %v4381_v45 = vadd.f32 %v4380_v44, %v4379_v43 }
 0xbf9   :  { %v4382_v46 = vrot.slane %v4381_v45, 1 }
 0xbfb   :  { %v4383_v47 = vadd.f32 %v4382_v46, %v4381_v45 }
 0xbfd   :  { %v4384_v48 = vmul.f32 0.0625, %v4383_v47 }
 0xbff   :  { %v4385_v38 = vsub.f32 %v4375_v39, %v4384_v48  ;;  %v4386_v49 = vsub.f32 %v4376_v10, %v4384_v48 }
 0xc01   :  { %v4387_v37 = vmul.f32 %v4385_v38, %v4385_v38  ;;  %v4388_v50 = vmul.f32 %v4386_v49, %v4386_v49 }
 0xc03   :  { %v4389_v51 = vadd.f32 %v4388_v50, %v4387_v37 }
 0xc05   :  { %v4390_v52 = vrot.slane %v4389_v51, 4 }
 0xc07   :  { %v4391_v53 = vadd.f32 %v4390_v52, %v4389_v51  ;;  %v4907_v51 = vld [vmem:[%s7226_s10 + $0x1] ss:$0 sm:$0xff] }
 0xc09   :  { %v4392_v54 = vrot.slane %v4391_v53, 2 }
 0xc0b   :  { %v4393_v55 = vadd.f32 %v4392_v54, %v4391_v53 }
 0xc0d   :  { %v4394_v56 = vrot.slane %v4393_v55, 1 }
 0xc0f   :  { %v4395_v57 = vadd.f32 %v4394_v56, %v4393_v55 }
 0xc11   :  { %v4396_v58 = vmul.f32 0.0625, %v4395_v57 }
 0xc13   :  { %v4397_v59 = vadd.f32 1e-05, %v4396_v58 }
 0xc15   :  { %5980 = vrsqrt.f32 %v4397_v59 }
 0xc22   :  { %v5981_v63 = vpop.eup %5980 }
 0xc23   :  { %v4401_v4 = vmul.f32 %v5981_v63, %v4866_v61 }
 0xc25   :  { %v4405_v0 = vrot.slane %v4401_v4, %v6627_v31 }
 0xc27   :  { %v4406_v3 = vmul.f32 %v4405_v0, %v4385_v38  ;;  %v4407_v36 = vmul.f32 %v4405_v0, %v4386_v49  ;;  %v4905_v38 = vld [vmem:[%s7225_s9 + $0x1] sm:$0x1]  ;;  %s5986_s9 = scalar_lea.vmem %s4694_s21, 256 }
 0xc28   :  { %p5987_p0 = scmp.ne.s32.totalorder %s4694_s21, %s5986_s9  ;;  %p5992_p2 = scmp.lt.s32.totalorder %s5986_s9, %s5986_s9 }
 0xc29   :  { %v4416_v40 = vadd.f32 %v4868_v1, %v4406_v3  ;;  %v4417_v5 = vadd.f32 %v4868_v1, %v4407_v36 }
 0xc2a   :  { %p5993_p3 = por %p5992_p2, %p5991_p1 }
 0xc2b   :  { %5866 = vmatprep.mubr.f32.mxu0 %v4416_v40 }
 0xc2c   :  { %5867 = vmatmul.mubr.f32.vlgmr.msra.gmra.mxu0 %v4417_v5  ;;  %p5994_p4 = pnand %p5993_p3, %p5987_p0 }
 0xcec   :  { %v5868_v13 = vpop.f32.mrf.mxu0 }
 0xced   :  { %v4515_v14 = vadd.f32 %v5868_v13, %v4886_v12 }
 0xcee   :  { %v4509_v15 = vpop.f32.mrf.mxu0 }
 0xcef   :  { %v4510_v16 = vadd.f32 %v4886_v12, %v4509_v15  ;;  %v4519_v18 = vmax.f32 %v4515_v14, 0.0 }
 0xcf1   :  { %v4518_v17 = vmax.f32 %v4510_v16, 0.0 }
 0xcf3   :  { %5901 = vmatprep.mubr.f32.mxu1 %v4518_v17 }
 0xcf4   :  { %5902 = vmatmul.mubr.f32.vlgmr.msra.gmra.mxu1 %v4519_v18 }
 0xdb4   :  { %v5903_v33 = vpop.f32.mrf.mxu1 }
 0xdb5   :  { %v4617_v20 = vadd.f32 %v5903_v33, %v4904_v19 }
 0xdb6   :  { %v4611_v21 = vpop.f32.mrf.mxu1 }
 0xdb7   :  { %v4612_v22 = vadd.f32 %v4904_v19, %v4611_v21  ;;  %v4621_v23 = vadd.f32 %v4617_v20, %v4417_v5 }
 0xdb9   :  { %v4620_v24 = vadd.f32 %v4612_v22, %v4416_v40 }
 0xdbb   :  { %v4622_v25 = vadd.f32 %v4621_v23, %v4620_v24 }
 0xdbd   :  { %v4623_v2 = vrot.slane %v4622_v25, 4 }
 0xdbf   :  { %v4624_v26 = vadd.f32 %v4623_v2, %v4622_v25 }
 0xdc1   :  { %v4625_v27 = vrot.slane %v4624_v26, 2 }
 0xdc3   :  { %v4626_v28 = vadd.f32 %v4625_v27, %v4624_v26 }
 0xdc5   :  { %v4627_v29 = vrot.slane %v4626_v28, 1 }
 0xdc7   :  { %v4628_v30 = vadd.f32 %v4627_v29, %v4626_v28 }
 0xdc9   :  { %v4629_v32 = vmul.f32 0.0625, %v4628_v30 }
 0xdcb   :  { %v4630_v34 = vsub.f32 %v4620_v24, %v4629_v32  ;;  %v4631_v35 = vsub.f32 %v4621_v23, %v4629_v32 }
 0xdcd   :  { %v4632_v9 = vmul.f32 %v4630_v34, %v4630_v34  ;;  %v4633_v10 = vmul.f32 %v4631_v35, %v4631_v35 }
 0xdcf   :  { %v4634_v39 = vadd.f32 %v4633_v10, %v4632_v9 }
 0xdd1   :  { %v4635_v41 = vrot.slane %v4634_v39, 4 }
 0xdd3   :  { %v4636_v42 = vadd.f32 %v4635_v41, %v4634_v39 }
 0xdd5   :  { %v4637_v43 = vrot.slane %v4636_v42, 2 }
 0xdd7   :  { %v4638_v44 = vadd.f32 %v4637_v43, %v4636_v42 }
 0xdd9   :  { %v4639_v45 = vrot.slane %v4638_v44, 1 }
 0xddb   :  { %v4640_v46 = vadd.f32 %v4639_v45, %v4638_v44 }
 0xddd   :  { %v4641_v47 = vmul.f32 0.0625, %v4640_v46 }
 0xddf   :  { %v4642_v48 = vadd.f32 1e-05, %v4641_v47 }
 0xde1   :  { %5982 = vrsqrt.f32 %v4642_v48 }
 0xdee   :  { %v5983_v49 = vpop.eup %5982 }
 0xdef   :  { %v4646_v37 = vmul.f32 %v5983_v49, %v4905_v38 }
 0xdf1   :  { %v4650_v50 = vrot.slane %v4646_v37, %v6627_v31 }
 0xdf3   :  { %v4651_v52 = vmul.f32 %v4650_v50, %v4630_v34  ;;  %v4652_v53 = vmul.f32 %v4650_v50, %v4631_v35 }
 0xdf5   :  { %v4661_v54 = vadd.f32 %v4907_v51, %v4651_v52  ;;  %v4662_v55 = vadd.f32 %v4907_v51, %v4652_v53 }
 0xdf7   :  { %v4663_v56 = vadd.f32 %v4661_v54, %v6769_v60  ;;  %v4664_v57 = vadd.f32 %v4662_v55, %v6774_v62 }
 0xdf9   :  { %4665 = vst [vmem:[#allocation2] sm:$0xff] %v4663_v56  ;;  %4666 = vst [vmem:[#allocation2 + $0x8] sm:$0xff] %v4664_v57  ;;  %v4667_v58 = vrot.slane %v4663_v56, 4  ;;  %v4673_v59 = vrot.slane %v4664_v57, 4 }
 0xdfa   :  { %5997 = shalt.err (!%p5994_p4)
}
 0xdfb   :  { %s6035_s10 = smov 128   ;;  %s6036_s22 = smov 8   ;;  %v4668_v31 = vadd.f32 %v4667_v58, %v4663_v56  ;;  %v4674_v60 = vadd.f32 %v4673_v59, %v4664_v57  ;;  %vm4684_vm3 = vcmask 1041409  }
 0xdfc   :  { %4699 = dma.vmem_to_hbm [thread:$0]  %s4694_s21, 256, %s7227_s11, [#allocation3], %s6035_s10, %s6035_s10, %s6036_s22  }
 0xdfd   :  { %v4669_v62 = vrot.slane %v4668_v31, 2  ;;  %v4675_v61 = vrot.slane %v4674_v60, 2  ;;  %s6037_s28 = smov [#allocation4]  }
 0xdfe   :  { %s4706_s23 = sshll.u32 %s6037_s28, 4  ;;  %s4707_s23 = int_to_ptr.vmem [resolvable:$true] %s4706_s23 }
 0xdff   :  { %v4670_v63 = vadd.f32 %v4669_v62, %v4668_v31  ;;  %v4676_v4 = vadd.f32 %v4675_v61, %v4674_v60  ;;  %s6006_s24 = scalar_lea.vmem %s4707_s23, 32  ;;  %p6011_p6 = scmp.lt.s32.totalorder %s4707_s23, %s4707_s23 }
 0xe00   :  { %p6007_p5 = scmp.ne.s32.totalorder %s4707_s23, %s6006_s24  ;;  %p6012_p7 = scmp.lt.s32.totalorder %s6006_s24, %s6006_s24 }
 0xe01   :  { %v4671_v0 = vrot.slane %v4670_v63, 1  ;;  %v4677_v1 = vrot.slane %v4676_v4, 1 }
 0xe02   :  { %p6013_p8 = por %p6012_p7, %p6011_p6 }
 0xe03   :  { %v4672_v3 = vadd.f32 %v4671_v0, %v4670_v63  ;;  %v4678_v36 = vadd.f32 %v4677_v1, %v4676_v4 }
 0xe04   :  { %p6014_p9 = pnand %p6013_p8, %p6007_p5 }
 0xe05   :  { %v4680_v40 = vmul.f32 0.125, %v4672_v3  ;;  %v4681_v5 = vmul.f32 0.125, %v4678_v36 }
 0xe07   :  { %v4685_v6 = vsel %vm4684_vm3, %v4681_v5, %v4680_v40 }
 0xe08   :  { %4687 = vst [vmem:[#allocation4] sm:$0x3] %v4685_v6 }
 0xe09   :  { %6017 = shalt.err (!%p6014_p9)
}
 0xe0a   :  { %4709 = dma.vmem_to_hbm [thread:$0]  %s4707_s23, 32, %s7228_s12, [#allocation5]  }
 0xe0b   :  { %6026 = dma.done.wait [#allocation3], 256  }
 0xe0c   :  { %6027 = vsyncadd [#allocation3], 4294967040 }
 0xe0d   :  { %6028 = dma.done.wait [#allocation5], 32  }
 0xe0e   :  { %6029 = vsyncadd [#allocation5], 4294967264 }
 0xe0f   :  { %4716 = vsyncpa [#allocation3], 1 }
 0xe10   :  { %4717 = vsyncpa [#allocation5], 1 }

</bundles_post_ra>
